<compile_context>
chip_gen: v7x
topology: tpu7x:2x2x1
jax: 0.10.0
libtpu: 0.0.40
codegen_flags: <defaults>
</compile_context>

<pallas_src>
import jax
import jax.numpy as jnp
from jax.experimental import pallas as pl
from jax.experimental.pallas import tpu as pltpu

PAD = 128  # lane width for packed rows


def pack_params(W_ih, W_hh, b_ih, b_hh, w_h2p, b_h2p):
    """Pack PyTorch-layout params into the kernel's lane-dense layout.

    W_ih: (4H, I), W_hh: (4H, H), b_ih/b_hh: (4H,), w_h2p: (1, 2H), b_h2p: (1,).
    """
    four_h, in_size = W_ih.shape
    H = four_h // 4
    GW = 4 * H
    # TODO(synk): tile the gate dimension for H > 32 / I > 128 (not needed here).
    assert in_size <= PAD and GW <= PAD and 2 * H + 1 <= PAD

    # Input->gate weights, rows 0:I = W_ih^T (used ONCE in the hoisted
    # (T,128)@(128,4H) pre-loop matmul), rest zero.
    W_ih_pad = jnp.zeros((PAD, GW), jnp.float32)
    W_ih_pad = W_ih_pad.at[0:in_size, :].set(W_ih.T.astype(jnp.float32))

    # Recurrent weights, rows 0:H = W_hh^T, rest zero so the padded lanes of
    # the hbar state row are annihilated.  K=128 -> single MXU pass per step.
    W_hh_pad = jnp.zeros((PAD, GW), jnp.float32)
    W_hh_pad = W_hh_pad.at[0:H, :].set(W_hh.T.astype(jnp.float32))

    # Small vector params, one lane-dense 128-wide row each.
    pvec = jnp.zeros((8, PAD), jnp.float32)
    pvec = pvec.at[0, 0:GW].set((b_ih + b_hh).astype(jnp.float32))       # merged bias
    pvec = pvec.at[1, 0:H].set(w_h2p[0, 0:H].astype(jnp.float32))        # h2p, old h half
    pvec = pvec.at[2, 0:H].set(w_h2p[0, H:2 * H].astype(jnp.float32))    # h2p, new hbar half
    pvec = pvec.at[3, 0].set(b_h2p[0].astype(jnp.float32))               # h2p bias
    pvec = pvec.at[4, 2 * H:3 * H].set(1.0)                              # tanh-lane mask
    return {"W_ih_pad": W_ih_pad, "W_hh_pad": W_hh_pad, "pvec": pvec,
            "input_size": in_size, "hidden_size": H}


def extractor_rollout(s_seq, h_seq, h0_, c0_, p0, packed):
    """Apply ExtractorCell.forward for T consecutive steps (batch = 1).

    s_seq: (T, I) s_{t-1} per step; h_seq: (T, H) h_t per step;
    h0_, c0_: (1, H) initial hbar/cbar; p0: (1, 1) initial p.
    Returns per-step outputs (h_all (T,H), c_all (T,H), p_all (T,1)).
    """
    T, in_size = s_seq.shape
    H = packed["hidden_size"]
    GW = 4 * H
    assert in_size == packed["input_size"] and h_seq.shape == (T, H)

    # Lane-dense packed per-step inputs: row t = [s_t | 0...] ++ [h_t | 0...].
    x_seq = jnp.zeros((T, 2 * PAD), jnp.float32)
    x_seq = x_seq.at[:, 0:in_size].set(s_seq.astype(jnp.float32))
    x_seq = x_seq.at[:, PAD:PAD + H].set(h_seq.astype(jnp.float32))

    # Initial recurrent state as separate sublane rows (no lane concats later):
    # row 0 = hbar (lanes 0:H), row 1 = cbar (lanes 0:H), row 2 = p (lane 0).
    state0 = jnp.zeros((8, PAD), jnp.float32)
    state0 = state0.at[0, 0:H].set(h0_[0].astype(jnp.float32))
    state0 = state0.at[1, 0:H].set(c0_[0].astype(jnp.float32))
    state0 = state0.at[2, 0].set(p0[0, 0].astype(jnp.float32))

    def kernel(x_ref, state0_ref, w_ih_ref, w_hh_ref, pvec_ref,
               out_ref, state_scr, gx_scr, q_scr):
        # ---------- hoisted, non-recurrent work (runs once) ----------
        # GX[t] = s_t @ W_ih^T : one (T,128)@(128,4H) MXU matmul, not T of them.
        gx_scr[...] = jnp.dot(x_ref[:, 0:PAD], w_ih_ref[...],
                              preferred_element_type=jnp.float32)
        # q[t] = h_t . w_h2p[:, :H] : one batched cross-lane reduce.
        w_old = pvec_ref[1:2, :]                       # (1, PAD), zero past H
        q_scr[...] = jnp.sum(x_ref[:, PAD:2 * PAD] * w_old,
                             axis=1, keepdims=True)

        # ---------- loop-invariant small params ----------
        w_hh = w_hh_ref[...]                           # (PAD, 4H), held in vregs
        b_row = pvec_ref[0:1, 0:GW]                    # (1, 4H) merged LSTM bias
        w_new = pvec_ref[2:3, 0:H]                     # (1, H)  h2p, new-hbar half
        b_h2p = pvec_ref[3:4, 0:1]                     # (1, 1)
        g_mask = pvec_ref[4:5, 0:GW]                   # 1.0 on the tanh (g) lanes
        one_plus_g = 1.0 + g_mask                      # 2.0 on g lanes, else 1.0

        state_scr[...] = state0_ref[...]

        @pl.loop(0, T, unroll=True)
        def _step(t):
            h_row = state_scr[0:1, :]                  # (1, PAD), zeros past H
            c_prev = state_scr[1:2, 0:H]               # (1, H)
            p_prev = state_scr[2:3, 0:1]               # (1, 1) at lane 0 (cheap splat)

            gates = (p_prev * gx_scr[pl.ds(t, 1), :]
                     + jnp.dot(h_row, w_hh, preferred_element_type=jnp.float32)
                     + b_row)                          # (1, 4H)

            # One EUP issue: tanh(x) = 2*sigmoid(2x) - 1 on the g lanes only.
            act = jax.nn.sigmoid(gates * one_plus_g) * one_plus_g - g_mask
            i_g = act[:, 0:H]
            f_g = act[:, H:2 * H]
            g_g = act[:, 2 * H:3 * H]
            o_g = act[:, 3 * H:4 * H]

            c_new = f_g * c_prev + i_g * g_g           # (1, H)
            h_new = o_g * jnp.tanh(c_new)              # (1, H)

            logit = (jnp.sum(h_new * w_new, axis=1, keepdims=True)
                     + q_scr[pl.ds(t, 1), :] + b_h2p)  # (1, 1)
            p_new = jax.nn.sigmoid(logit)

            # Sublane-row state updates (no lane concatenates on the chain).
            state_scr[0:1, 0:H] = h_new
            state_scr[1:2, 0:H] = c_new
            state_scr[2:3, 0:1] = p_new

            # One full-vreg per-step output store (off the recurrence chain).
            out_ref[t] = state_scr[...]

    vmem = pl.BlockSpec(memory_space=pltpu.MemorySpace.VMEM)
    cost = pl.CostEstimate(
        flops=(2 * T * PAD * GW       # hoisted input-gate matmul
               + 2 * T * PAD * GW     # per-step recurrent matmuls
               + 2 * T * PAD          # hoisted h2p reduce
               + 32 * T * GW),        # per-step elementwise
        transcendentals=T * (GW + H + 1),
        bytes_accessed=(x_seq.size + state0.size + packed["W_ih_pad"].size
                        + packed["W_hh_pad"].size + packed["pvec"].size
                        + T * 8 * PAD) * 4,
    )
    out = pl.pallas_call(
        kernel,
        out_shape=jax.ShapeDtypeStruct((T, 8, PAD), jnp.float32),
        in_specs=[vmem, vmem, vmem, vmem, vmem],
        out_specs=vmem,
        scratch_shapes=[pltpu.VMEM((8, PAD), jnp.float32),   # carried state rows
                        pltpu.VMEM((T, GW), jnp.float32),    # hoisted GX
                        pltpu.VMEM((T, 1), jnp.float32)],    # hoisted q
        cost_estimate=cost,
    )(x_seq, state0, packed["W_ih_pad"], packed["W_hh_pad"], packed["pvec"])

    return out[:, 0, 0:H], out[:, 1, 0:H], out[:, 2, 0:1]


def extractor_cell(s, h, h_, c_, p, packed):
    """Single ExtractorCell.forward step (batch=1): rollout with T=1."""
    return extractor_rollout(s, h, h_, c_, p, packed)


# ----------------------------- pure-JAX reference -----------------------------
def _reference_cell(s, h, h_, c_, p, raw):
    H = raw["W_hh"].shape[1]
    s_w = p * s
    gates = s_w @ raw["W_ih"].T + raw["b_ih"] + h_ @ raw["W_hh"].T + raw["b_hh"]
    i_g = jax.nn.sigmoid(gates[:, 0 * H:1 * H])
    f_g = jax.nn.sigmoid(gates[:, 1 * H:2 * H])
    g_g = jnp.tanh(gates[:, 2 * H:3 * H])
    o_g = jax.nn.sigmoid(gates[:, 3 * H:4 * H])
    c_new = f_g * c_ + i_g * g_g
    h_new = o_g * jnp.tanh(c_new)
    h_cat = jnp.concatenate([h, h_new], axis=1)
    logit = h_cat @ raw["w_h2p"].T + raw["b_h2p"]
    return h_new, c_new, jax.nn.sigmoid(logit)


def _reference_rollout(s_seq, h_seq, h0_, c0_, p0, raw):
    h_, c_, p = h0_, c0_, p0
    hs, cs, ps = [], [], []
    for t in range(s_seq.shape[0]):
        h_, c_, p = _reference_cell(s_seq[t:t + 1], h_seq[t:t + 1], h_, c_, p, raw)
        hs.append(h_); cs.append(c_); ps.append(p)
    return (jnp.concatenate(hs, 0), jnp.concatenate(cs, 0), jnp.concatenate(ps, 0))


if __name__ == "__main__":
    input_size, hidden_size, seq_len = 16, 32, 8

    key = jax.random.PRNGKey(0)
    keys = jax.random.split(key, 12)

    # Deterministic synthetic parameters (shapes per nn.LSTMCell / nn.Linear).
    W_ih = jax.random.normal(keys[0], (4 * hidden_size, input_size), jnp.float32) * 0.1
    W_hh = jax.random.normal(keys[1], (4 * hidden_size, hidden_size), jnp.float32) * 0.1
    b_ih = jax.random.normal(keys[2], (4 * hidden_size,), jnp.float32) * 0.1
    b_hh = jax.random.normal(keys[3], (4 * hidden_size,), jnp.float32) * 0.1
    w_h2p = jax.random.normal(keys[4], (1, 2 * hidden_size), jnp.float32) * 0.1
    b_h2p = jax.random.normal(keys[5], (1,), jnp.float32) * 0.1
    raw = {"W_ih": W_ih, "W_hh": W_hh, "b_ih": b_ih, "b_hh": b_hh,
           "w_h2p": w_h2p, "b_h2p": b_h2p}
    packed = pack_params(W_ih, W_hh, b_ih, b_hh, w_h2p, b_h2p)

    # Per-step external inputs (s_{t-1}, h_t) and initial recurrent state.
    s_seq = jax.random.normal(keys[6], (seq_len, input_size), jnp.float32)
    h_seq = jax.random.normal(keys[7], (seq_len, hidden_size), jnp.float32)
    h0_ = jax.random.normal(keys[8], (1, hidden_size), jnp.float32)
    c0_ = jax.random.normal(keys[9], (1, hidden_size), jnp.float32)
    p0 = jax.nn.sigmoid(jax.random.normal(keys[10], (1, 1), jnp.float32))

    # Fused multi-step rollout (the hot path).
    h_all, c_all, p_all = extractor_rollout(s_seq, h_seq, h0_, c0_, p0, packed)
    jax.block_until_ready((h_all, c_all, p_all))

    h_ref, c_ref, p_ref = _reference_rollout(s_seq, h_seq, h0_, c0_, p0, raw)
    assert jnp.allclose(h_all, h_ref, atol=1e-4), "h mismatch"
    assert jnp.allclose(c_all, c_ref, atol=1e-4), "c mismatch"
    assert jnp.allclose(p_all, p_ref, atol=1e-4), "p mismatch"

    # Single-step call matching the module's forward signature (T = 1).
    h1, c1, p1 = extractor_cell(s_seq[0:1], h_seq[0:1], h0_, c0_, p0, packed)
    jax.block_until_ready((h1, c1, p1))
    h1_r, c1_r, p1_r = _reference_cell(s_seq[0:1], h_seq[0:1], h0_, c0_, p0, raw)
    assert jnp.allclose(h1, h1_r, atol=1e-4), "single-step h mismatch"
    assert jnp.allclose(c1, c1_r, atol=1e-4), "single-step c mismatch"
    assert jnp.allclose(p1, p1_r, atol=1e-4), "single-step p mismatch"

    print("KERNEL_OK")
</pallas_src>

<mosaic_0001>
module attributes {stable_mosaic.version = 11 : i64} {
  func.func @kernel(%arg0: memref<8x256xf32, #tpu.memory_space<vmem>>, %arg1: memref<8x128xf32, #tpu.memory_space<vmem>>, %arg2: memref<128x128xf32, #tpu.memory_space<vmem>>, %arg3: memref<128x128xf32, #tpu.memory_space<vmem>>, %arg4: memref<8x128xf32, #tpu.memory_space<vmem>>, %arg5: memref<8x8x128xf32, #tpu.memory_space<vmem>>, %arg6: memref<8x128xf32, #tpu.memory_space<vmem>>, %arg7: memref<8x128xf32, #tpu.memory_space<vmem>>, %arg8: memref<8x1xf32, #tpu.memory_space<vmem>>) attributes {dimension_semantics = [], scalar_prefetch = 0 : i64, scratch_operands = 3 : i64, tpu.core_type = #tpu.core_type<tc>} {
    %c0 = arith.constant 0 : index
    %c0_0 = arith.constant 0 : index
    %0 = vector.load %arg0[%c0, %c0_0] : memref<8x256xf32, #tpu.memory_space<vmem>>, vector<8x128xf32>
    %c0_1 = arith.constant 0 : index
    %c0_2 = arith.constant 0 : index
    %1 = vector.load %arg2[%c0_1, %c0_2] : memref<128x128xf32, #tpu.memory_space<vmem>>, vector<128x128xf32>
    %cst = arith.constant dense<0.000000e+00> : vector<8x128xf32>
    %2 = tpu.matmul %0, %1, %cst {dimension_numbers = #tpu.dot_dimension_numbers<[1], [0], [0], [1], [0, 0, 1, 1], [], []>} : vector<8x128xf32>, vector<128x128xf32>, vector<8x128xf32> -> vector<8x128xf32>
    %c0_3 = arith.constant 0 : index
    %c0_4 = arith.constant 0 : index
    %3 = vector.load %arg7[%c0_3, %c0_4] : memref<8x128xf32, #tpu.memory_space<vmem>>, vector<8x128xf32>
    tpu.vector_store %arg7[%c0_3, %c0_4], %2 {strides = array<i32>} : memref<8x128xf32, #tpu.memory_space<vmem>>, vector<8x128xf32>,
    %c1 = arith.constant 1 : index
    %c0_5 = arith.constant 0 : index
    %4 = vector.load %arg4[%c1, %c0_5] : memref<8x128xf32, #tpu.memory_space<vmem>>, vector<1x128xf32>
    %c0_6 = arith.constant 0 : index
    %c128 = arith.constant 128 : index
    %5 = vector.load %arg0[%c0_6, %c128] : memref<8x256xf32, #tpu.memory_space<vmem>>, vector<8x128xf32>
    %6 = vector.broadcast %4 : vector<1x128xf32> to vector<8x128xf32>
    %7 = arith.mulf %5, %6 : vector<8x128xf32>
    %cst_7 = arith.constant dense<0.000000e+00> : vector<8xf32>
    %8 = vector.multi_reduction <add>, %7, %cst_7 [1] : vector<8x128xf32> to vector<8xf32>
    %9 = vector.shape_cast %8 : vector<8xf32> to vector<8x1xf32>
    %c0_8 = arith.constant 0 : index
    %c0_9 = arith.constant 0 : index
    %10 = vector.load %arg8[%c0_8, %c0_9] : memref<8x1xf32, #tpu.memory_space<vmem>>, vector<8x1xf32>
    tpu.vector_store %arg8[%c0_8, %c0_9], %9 {strides = array<i32>} : memref<8x1xf32, #tpu.memory_space<vmem>>, vector<8x1xf32>,
    %c0_10 = arith.constant 0 : index
    %c0_11 = arith.constant 0 : index
    %11 = vector.load %arg3[%c0_10, %c0_11] : memref<128x128xf32, #tpu.memory_space<vmem>>, vector<128x128xf32>
    %c0_12 = arith.constant 0 : index
    %c0_13 = arith.constant 0 : index
    %12 = vector.load %arg4[%c0_12, %c0_13] : memref<8x128xf32, #tpu.memory_space<vmem>>, vector<1x128xf32>
    %c2 = arith.constant 2 : index
    %c0_14 = arith.constant 0 : index
    %13 = vector.load %arg4[%c2, %c0_14] : memref<8x128xf32, #tpu.memory_space<vmem>>, vector<1x32xf32>
    %c3 = arith.constant 3 : index
    %c0_15 = arith.constant 0 : index
    %14 = vector.load %arg4[%c3, %c0_15] : memref<8x128xf32, #tpu.memory_space<vmem>>, vector<1x1xf32>
    %c4 = arith.constant 4 : index
    %c0_16 = arith.constant 0 : index
    %15 = vector.load %arg4[%c4, %c0_16] : memref<8x128xf32, #tpu.memory_space<vmem>>, vector<1x128xf32>
    %cst_17 = arith.constant 1.000000e+00 : f32
    %16 = vector.broadcast %cst_17 : f32 to vector<1x128xf32>
    %17 = arith.addf %16, %15 : vector<1x128xf32>
    %c0_18 = arith.constant 0 : index
    %c0_19 = arith.constant 0 : index
    %18 = vector.load %arg1[%c0_18, %c0_19] : memref<8x128xf32, #tpu.memory_space<vmem>>, vector<8x128xf32>
    %c0_20 = arith.constant 0 : index
    %c0_21 = arith.constant 0 : index
    %19 = vector.load %arg6[%c0_20, %c0_21] : memref<8x128xf32, #tpu.memory_space<vmem>>, vector<8x128xf32>
    tpu.vector_store %arg6[%c0_20, %c0_21], %18 {strides = array<i32>} : memref<8x128xf32, #tpu.memory_space<vmem>>, vector<8x128xf32>,
    %c0_i32 = arith.constant 0 : i32
    %c1_i32 = arith.constant 1 : i32
    %20 = arith.muli %c0_i32, %c1_i32 : i32
    %c0_i32_22 = arith.constant 0 : i32
    %21 = arith.addi %c0_i32_22, %20 : i32
    %c0_23 = arith.constant 0 : index
    %c0_24 = arith.constant 0 : index
    %22 = vector.load %arg6[%c0_23, %c0_24] : memref<8x128xf32, #tpu.memory_space<vmem>>, vector<1x128xf32>
    %c1_25 = arith.constant 1 : index
    %c0_26 = arith.constant 0 : index
    %23 = vector.load %arg6[%c1_25, %c0_26] : memref<8x128xf32, #tpu.memory_space<vmem>>, vector<1x32xf32>
    %c2_27 = arith.constant 2 : index
    %c0_28 = arith.constant 0 : index
    %24 = vector.load %arg6[%c2_27, %c0_28] : memref<8x128xf32, #tpu.memory_space<vmem>>, vector<1x1xf32>
    %25 = arith.index_cast %21 : i32 to index
    %c0_29 = arith.constant 0 : index
    %26 = vector.load %arg7[%25, %c0_29] : memref<8x128xf32, #tpu.memory_space<vmem>>, vector<1x128xf32>
    %27 = vector.broadcast %24 : vector<1x1xf32> to vector<1x128xf32>
    %28 = arith.mulf %27, %26 : vector<1x128xf32>
    %cst_30 = arith.constant dense<0.000000e+00> : vector<1x128xf32>
    %29 = tpu.matmul %22, %11, %cst_30 {dimension_numbers = #tpu.dot_dimension_numbers<[1], [0], [0], [1], [0, 0, 1, 1], [], []>} : vector<1x128xf32>, vector<128x128xf32>, vector<1x128xf32> -> vector<1x128xf32>
    %30 = arith.addf %28, %29 : vector<1x128xf32>
    %31 = arith.addf %30, %12 : vector<1x128xf32>
    %32 = arith.mulf %31, %17 : vector<1x128xf32>
    %33 = arith.negf %32 : vector<1x128xf32>
    %34 = math.exp %33 : vector<1x128xf32>
    %cst_31 = arith.constant 1.000000e+00 : f32
    %35 = vector.broadcast %cst_31 : f32 to vector<1x128xf32>
    %36 = arith.addf %35, %34 : vector<1x128xf32>
    %37 = arith.divf %35, %36 : vector<1x128xf32>
    %38 = arith.mulf %37, %17 : vector<1x128xf32>
    %39 = arith.subf %38, %15 : vector<1x128xf32>
    %40 = vector.extract_strided_slice %39 {offsets = [0, 0], sizes = [1, 32], strides = [1, 1]} : vector<1x128xf32> to vector<1x32xf32>
    %41 = vector.extract_strided_slice %39 {offsets = [0, 32], sizes = [1, 32], strides = [1, 1]} : vector<1x128xf32> to vector<1x32xf32>
    %42 = vector.extract_strided_slice %39 {offsets = [0, 64], sizes = [1, 32], strides = [1, 1]} : vector<1x128xf32> to vector<1x32xf32>
    %43 = vector.extract_strided_slice %39 {offsets = [0, 96], sizes = [1, 32], strides = [1, 1]} : vector<1x128xf32> to vector<1x32xf32>
    %44 = arith.mulf %41, %23 : vector<1x32xf32>
    %45 = arith.mulf %40, %42 : vector<1x32xf32>
    %46 = arith.addf %44, %45 : vector<1x32xf32>
    %47 = math.tanh %46 : vector<1x32xf32>
    %48 = arith.mulf %43, %47 : vector<1x32xf32>
    %49 = arith.mulf %48, %13 : vector<1x32xf32>
    %cst_32 = arith.constant dense<0.000000e+00> : vector<1xf32>
    %50 = vector.multi_reduction <add>, %49, %cst_32 [1] : vector<1x32xf32> to vector<1xf32>
    %51 = vector.shape_cast %50 : vector<1xf32> to vector<1x1xf32>
    %52 = arith.index_cast %21 : i32 to index
    %c0_33 = arith.constant 0 : index
    %53 = vector.load %arg8[%52, %c0_33] : memref<8x1xf32, #tpu.memory_space<vmem>>, vector<1x1xf32>
    %54 = arith.addf %51, %53 : vector<1x1xf32>
    %55 = arith.addf %54, %14 : vector<1x1xf32>
    %56 = arith.negf %55 : vector<1x1xf32>
    %57 = math.exp %56 : vector<1x1xf32>
    %cst_34 = arith.constant 1.000000e+00 : f32
    %58 = vector.broadcast %cst_34 : f32 to vector<1x1xf32>
    %59 = arith.addf %58, %57 : vector<1x1xf32>
    %60 = arith.divf %58, %59 : vector<1x1xf32>
    %c0_35 = arith.constant 0 : index
    %c0_36 = arith.constant 0 : index
    %61 = vector.load %arg6[%c0_35, %c0_36] : memref<8x128xf32, #tpu.memory_space<vmem>>, vector<1x32xf32>
    tpu.vector_store %arg6[%c0_35, %c0_36], %48 {strides = array<i32>} : memref<8x128xf32, #tpu.memory_space<vmem>>, vector<1x32xf32>,
    %c1_37 = arith.constant 1 : index
    %c0_38 = arith.constant 0 : index
    %62 = vector.load %arg6[%c1_37, %c0_38] : memref<8x128xf32, #tpu.memory_space<vmem>>, vector<1x32xf32>
    tpu.vector_store %arg6[%c1_37, %c0_38], %46 {strides = array<i32>} : memref<8x128xf32, #tpu.memory_space<vmem>>, vector<1x32xf32>,
    %c2_39 = arith.constant 2 : index
    %c0_40 = arith.constant 0 : index
    %63 = vector.load %arg6[%c2_39, %c0_40] : memref<8x128xf32, #tpu.memory_space<vmem>>, vector<1x1xf32>
    tpu.vector_store %arg6[%c2_39, %c0_40], %60 {strides = array<i32>} : memref<8x128xf32, #tpu.memory_space<vmem>>, vector<1x1xf32>,
    %c0_41 = arith.constant 0 : index
    %c0_42 = arith.constant 0 : index
    %64 = vector.load %arg6[%c0_41, %c0_42] : memref<8x128xf32, #tpu.memory_space<vmem>>, vector<8x128xf32>
    %65 = arith.index_cast %21 : i32 to index
    %c0_43 = arith.constant 0 : index
    %c0_44 = arith.constant 0 : index
    %66 = vector.load %arg5[%65, %c0_43, %c0_44] : memref<8x8x128xf32, #tpu.memory_space<vmem>>, vector<1x8x128xf32>
    %67 = vector.shape_cast %66 : vector<1x8x128xf32> to vector<8x128xf32>
    %68 = vector.shape_cast %64 : vector<8x128xf32> to vector<1x8x128xf32>
    tpu.vector_store %arg5[%65, %c0_43, %c0_44], %68 {strides = array<i32>} : memref<8x8x128xf32, #tpu.memory_space<vmem>>, vector<1x8x128xf32>,
    %c1_i32_45 = arith.constant 1 : i32
    %c1_i32_46 = arith.constant 1 : i32
    %69 = arith.muli %c1_i32_45, %c1_i32_46 : i32
    %c0_i32_47 = arith.constant 0 : i32
    %70 = arith.addi %c0_i32_47, %69 : i32
    %c0_48 = arith.constant 0 : index
    %c0_49 = arith.constant 0 : index
    %71 = vector.load %arg6[%c0_48, %c0_49] : memref<8x128xf32, #tpu.memory_space<vmem>>, vector<1x128xf32>
    %c1_50 = arith.constant 1 : index
    %c0_51 = arith.constant 0 : index
    %72 = vector.load %arg6[%c1_50, %c0_51] : memref<8x128xf32, #tpu.memory_space<vmem>>, vector<1x32xf32>
    %c2_52 = arith.constant 2 : index
    %c0_53 = arith.constant 0 : index
    %73 = vector.load %arg6[%c2_52, %c0_53] : memref<8x128xf32, #tpu.memory_space<vmem>>, vector<1x1xf32>
    %74 = arith.index_cast %70 : i32 to index
    %c0_54 = arith.constant 0 : index
    %75 = vector.load %arg7[%74, %c0_54] : memref<8x128xf32, #tpu.memory_space<vmem>>, vector<1x128xf32>
    %76 = vector.broadcast %73 : vector<1x1xf32> to vector<1x128xf32>
    %77 = arith.mulf %76, %75 : vector<1x128xf32>
    %cst_55 = arith.constant dense<0.000000e+00> : vector<1x128xf32>
    %78 = tpu.matmul %71, %11, %cst_55 {dimension_numbers = #tpu.dot_dimension_numbers<[1], [0], [0], [1], [0, 0, 1, 1], [], []>} : vector<1x128xf32>, vector<128x128xf32>, vector<1x128xf32> -> vector<1x128xf32>
    %79 = arith.addf %77, %78 : vector<1x128xf32>
    %80 = arith.addf %79, %12 : vector<1x128xf32>
    %81 = arith.mulf %80, %17 : vector<1x128xf32>
    %82 = arith.negf %81 : vector<1x128xf32>
    %83 = math.exp %82 : vector<1x128xf32>
    %cst_56 = arith.constant 1.000000e+00 : f32
    %84 = vector.broadcast %cst_56 : f32 to vector<1x128xf32>
    %85 = arith.addf %84, %83 : vector<1x128xf32>
    %86 = arith.divf %84, %85 : vector<1x128xf32>
    %87 = arith.mulf %86, %17 : vector<1x128xf32>
    %88 = arith.subf %87, %15 : vector<1x128xf32>
    %89 = vector.extract_strided_slice %88 {offsets = [0, 0], sizes = [1, 32], strides = [1, 1]} : vector<1x128xf32> to vector<1x32xf32>
    %90 = vector.extract_strided_slice %88 {offsets = [0, 32], sizes = [1, 32], strides = [1, 1]} : vector<1x128xf32> to vector<1x32xf32>
    %91 = vector.extract_strided_slice %88 {offsets = [0, 64], sizes = [1, 32], strides = [1, 1]} : vector<1x128xf32> to vector<1x32xf32>
    %92 = vector.extract_strided_slice %88 {offsets = [0, 96], sizes = [1, 32], strides = [1, 1]} : vector<1x128xf32> to vector<1x32xf32>
    %93 = arith.mulf %90, %72 : vector<1x32xf32>
    %94 = arith.mulf %89, %91 : vector<1x32xf32>
    %95 = arith.addf %93, %94 : vector<1x32xf32>
    %96 = math.tanh %95 : vector<1x32xf32>
    %97 = arith.mulf %92, %96 : vector<1x32xf32>
    %98 = arith.mulf %97, %13 : vector<1x32xf32>
    %cst_57 = arith.constant dense<0.000000e+00> : vector<1xf32>
    %99 = vector.multi_reduction <add>, %98, %cst_57 [1] : vector<1x32xf32> to vector<1xf32>
    %100 = vector.shape_cast %99 : vector<1xf32> to vector<1x1xf32>
    %101 = arith.index_cast %70 : i32 to index
    %c0_58 = arith.constant 0 : index
    %102 = vector.load %arg8[%101, %c0_58] : memref<8x1xf32, #tpu.memory_space<vmem>>, vector<1x1xf32>
    %103 = arith.addf %100, %102 : vector<1x1xf32>
    %104 = arith.addf %103, %14 : vector<1x1xf32>
    %105 = arith.negf %104 : vector<1x1xf32>
    %106 = math.exp %105 : vector<1x1xf32>
    %cst_59 = arith.constant 1.000000e+00 : f32
    %107 = vector.broadcast %cst_59 : f32 to vector<1x1xf32>
    %108 = arith.addf %107, %106 : vector<1x1xf32>
    %109 = arith.divf %107, %108 : vector<1x1xf32>
    %c0_60 = arith.constant 0 : index
    %c0_61 = arith.constant 0 : index
    %110 = vector.load %arg6[%c0_60, %c0_61] : memref<8x128xf32, #tpu.memory_space<vmem>>, vector<1x32xf32>
    tpu.vector_store %arg6[%c0_60, %c0_61], %97 {strides = array<i32>} : memref<8x128xf32, #tpu.memory_space<vmem>>, vector<1x32xf32>,
    %c1_62 = arith.constant 1 : index
    %c0_63 = arith.constant 0 : index
    %111 = vector.load %arg6[%c1_62, %c0_63] : memref<8x128xf32, #tpu.memory_space<vmem>>, vector<1x32xf32>
    tpu.vector_store %arg6[%c1_62, %c0_63], %95 {strides = array<i32>} : memref<8x128xf32, #tpu.memory_space<vmem>>, vector<1x32xf32>,
    %c2_64 = arith.constant 2 : index
    %c0_65 = arith.constant 0 : index
    %112 = vector.load %arg6[%c2_64, %c0_65] : memref<8x128xf32, #tpu.memory_space<vmem>>, vector<1x1xf32>
    tpu.vector_store %arg6[%c2_64, %c0_65], %109 {strides = array<i32>} : memref<8x128xf32, #tpu.memory_space<vmem>>, vector<1x1xf32>,
    %c0_66 = arith.constant 0 : index
    %c0_67 = arith.constant 0 : index
    %113 = vector.load %arg6[%c0_66, %c0_67] : memref<8x128xf32, #tpu.memory_space<vmem>>, vector<8x128xf32>
    %114 = arith.index_cast %70 : i32 to index
    %c0_68 = arith.constant 0 : index
    %c0_69 = arith.constant 0 : index
    %115 = vector.load %arg5[%114, %c0_68, %c0_69] : memref<8x8x128xf32, #tpu.memory_space<vmem>>, vector<1x8x128xf32>
    %116 = vector.shape_cast %115 : vector<1x8x128xf32> to vector<8x128xf32>
    %117 = vector.shape_cast %113 : vector<8x128xf32> to vector<1x8x128xf32>
    tpu.vector_store %arg5[%114, %c0_68, %c0_69], %117 {strides = array<i32>} : memref<8x8x128xf32, #tpu.memory_space<vmem>>, vector<1x8x128xf32>,
    %c2_i32 = arith.constant 2 : i32
    %c1_i32_70 = arith.constant 1 : i32
    %118 = arith.muli %c2_i32, %c1_i32_70 : i32
    %c0_i32_71 = arith.constant 0 : i32
    %119 = arith.addi %c0_i32_71, %118 : i32
    %c0_72 = arith.constant 0 : index
    %c0_73 = arith.constant 0 : index
    %120 = vector.load %arg6[%c0_72, %c0_73] : memref<8x128xf32, #tpu.memory_space<vmem>>, vector<1x128xf32>
    %c1_74 = arith.constant 1 : index
    %c0_75 = arith.constant 0 : index
    %121 = vector.load %arg6[%c1_74, %c0_75] : memref<8x128xf32, #tpu.memory_space<vmem>>, vector<1x32xf32>
    %c2_76 = arith.constant 2 : index
    %c0_77 = arith.constant 0 : index
    %122 = vector.load %arg6[%c2_76, %c0_77] : memref<8x128xf32, #tpu.memory_space<vmem>>, vector<1x1xf32>
    %123 = arith.index_cast %119 : i32 to index
    %c0_78 = arith.constant 0 : index
    %124 = vector.load %arg7[%123, %c0_78] : memref<8x128xf32, #tpu.memory_space<vmem>>, vector<1x128xf32>
    %125 = vector.broadcast %122 : vector<1x1xf32> to vector<1x128xf32>
    %126 = arith.mulf %125, %124 : vector<1x128xf32>
    %cst_79 = arith.constant dense<0.000000e+00> : vector<1x128xf32>
    %127 = tpu.matmul %120, %11, %cst_79 {dimension_numbers = #tpu.dot_dimension_numbers<[1], [0], [0], [1], [0, 0, 1, 1], [], []>} : vector<1x128xf32>, vector<128x128xf32>, vector<1x128xf32> -> vector<1x128xf32>
    %128 = arith.addf %126, %127 : vector<1x128xf32>
    %129 = arith.addf %128, %12 : vector<1x128xf32>
    %130 = arith.mulf %129, %17 : vector<1x128xf32>
    %131 = arith.negf %130 : vector<1x128xf32>
    %132 = math.exp %131 : vector<1x128xf32>
    %cst_80 = arith.constant 1.000000e+00 : f32
    %133 = vector.broadcast %cst_80 : f32 to vector<1x128xf32>
    %134 = arith.addf %133, %132 : vector<1x128xf32>
    %135 = arith.divf %133, %134 : vector<1x128xf32>
    %136 = arith.mulf %135, %17 : vector<1x128xf32>
    %137 = arith.subf %136, %15 : vector<1x128xf32>
    %138 = vector.extract_strided_slice %137 {offsets = [0, 0], sizes = [1, 32], strides = [1, 1]} : vector<1x128xf32> to vector<1x32xf32>
    %139 = vector.extract_strided_slice %137 {offsets = [0, 32], sizes = [1, 32], strides = [1, 1]} : vector<1x128xf32> to vector<1x32xf32>
    %140 = vector.extract_strided_slice %137 {offsets = [0, 64], sizes = [1, 32], strides = [1, 1]} : vector<1x128xf32> to vector<1x32xf32>
    %141 = vector.extract_strided_slice %137 {offsets = [0, 96], sizes = [1, 32], strides = [1, 1]} : vector<1x128xf32> to vector<1x32xf32>
    %142 = arith.mulf %139, %121 : vector<1x32xf32>
    %143 = arith.mulf %138, %140 : vector<1x32xf32>
    %144 = arith.addf %142, %143 : vector<1x32xf32>
    %145 = math.tanh %144 : vector<1x32xf32>
    %146 = arith.mulf %141, %145 : vector<1x32xf32>
    %147 = arith.mulf %146, %13 : vector<1x32xf32>
    %cst_81 = arith.constant dense<0.000000e+00> : vector<1xf32>
    %148 = vector.multi_reduction <add>, %147, %cst_81 [1] : vector<1x32xf32> to vector<1xf32>
    %149 = vector.shape_cast %148 : vector<1xf32> to vector<1x1xf32>
    %150 = arith.index_cast %119 : i32 to index
    %c0_82 = arith.constant 0 : index
    %151 = vector.load %arg8[%150, %c0_82] : memref<8x1xf32, #tpu.memory_space<vmem>>, vector<1x1xf32>
    %152 = arith.addf %149, %151 : vector<1x1xf32>
    %153 = arith.addf %152, %14 : vector<1x1xf32>
    %154 = arith.negf %153 : vector<1x1xf32>
    %155 = math.exp %154 : vector<1x1xf32>
    %cst_83 = arith.constant 1.000000e+00 : f32
    %156 = vector.broadcast %cst_83 : f32 to vector<1x1xf32>
    %157 = arith.addf %156, %155 : vector<1x1xf32>
    %158 = arith.divf %156, %157 : vector<1x1xf32>
    %c0_84 = arith.constant 0 : index
    %c0_85 = arith.constant 0 : index
    %159 = vector.load %arg6[%c0_84, %c0_85] : memref<8x128xf32, #tpu.memory_space<vmem>>, vector<1x32xf32>
    tpu.vector_store %arg6[%c0_84, %c0_85], %146 {strides = array<i32>} : memref<8x128xf32, #tpu.memory_space<vmem>>, vector<1x32xf32>,
    %c1_86 = arith.constant 1 : index
    %c0_87 = arith.constant 0 : index
    %160 = vector.load %arg6[%c1_86, %c0_87] : memref<8x128xf32, #tpu.memory_space<vmem>>, vector<1x32xf32>
    tpu.vector_store %arg6[%c1_86, %c0_87], %144 {strides = array<i32>} : memref<8x128xf32, #tpu.memory_space<vmem>>, vector<1x32xf32>,
    %c2_88 = arith.constant 2 : index
    %c0_89 = arith.constant 0 : index
    %161 = vector.load %arg6[%c2_88, %c0_89] : memref<8x128xf32, #tpu.memory_space<vmem>>, vector<1x1xf32>
    tpu.vector_store %arg6[%c2_88, %c0_89], %158 {strides = array<i32>} : memref<8x128xf32, #tpu.memory_space<vmem>>, vector<1x1xf32>,
    %c0_90 = arith.constant 0 : index
    %c0_91 = arith.constant 0 : index
    %162 = vector.load %arg6[%c0_90, %c0_91] : memref<8x128xf32, #tpu.memory_space<vmem>>, vector<8x128xf32>
    %163 = arith.index_cast %119 : i32 to index
    %c0_92 = arith.constant 0 : index
    %c0_93 = arith.constant 0 : index
    %164 = vector.load %arg5[%163, %c0_92, %c0_93] : memref<8x8x128xf32, #tpu.memory_space<vmem>>, vector<1x8x128xf32>
    %165 = vector.shape_cast %164 : vector<1x8x128xf32> to vector<8x128xf32>
    %166 = vector.shape_cast %162 : vector<8x128xf32> to vector<1x8x128xf32>
    tpu.vector_store %arg5[%163, %c0_92, %c0_93], %166 {strides = array<i32>} : memref<8x8x128xf32, #tpu.memory_space<vmem>>, vector<1x8x128xf32>,
    %c3_i32 = arith.constant 3 : i32
    %c1_i32_94 = arith.constant 1 : i32
    %167 = arith.muli %c3_i32, %c1_i32_94 : i32
    %c0_i32_95 = arith.constant 0 : i32
    %168 = arith.addi %c0_i32_95, %167 : i32
    %c0_96 = arith.constant 0 : index
    %c0_97 = arith.constant 0 : index
    %169 = vector.load %arg6[%c0_96, %c0_97] : memref<8x128xf32, #tpu.memory_space<vmem>>, vector<1x128xf32>
    %c1_98 = arith.constant 1 : index
    %c0_99 = arith.constant 0 : index
    %170 = vector.load %arg6[%c1_98, %c0_99] : memref<8x128xf32, #tpu.memory_space<vmem>>, vector<1x32xf32>
    %c2_100 = arith.constant 2 : index
    %c0_101 = arith.constant 0 : index
    %171 = vector.load %arg6[%c2_100, %c0_101] : memref<8x128xf32, #tpu.memory_space<vmem>>, vector<1x1xf32>
    %172 = arith.index_cast %168 : i32 to index
    %c0_102 = arith.constant 0 : index
    %173 = vector.load %arg7[%172, %c0_102] : memref<8x128xf32, #tpu.memory_space<vmem>>, vector<1x128xf32>
    %174 = vector.broadcast %171 : vector<1x1xf32> to vector<1x128xf32>
    %175 = arith.mulf %174, %173 : vector<1x128xf32>
    %cst_103 = arith.constant dense<0.000000e+00> : vector<1x128xf32>
    %176 = tpu.matmul %169, %11, %cst_103 {dimension_numbers = #tpu.dot_dimension_numbers<[1], [0], [0], [1], [0, 0, 1, 1], [], []>} : vector<1x128xf32>, vector<128x128xf32>, vector<1x128xf32> -> vector<1x128xf32>
    %177 = arith.addf %175, %176 : vector<1x128xf32>
    %178 = arith.addf %177, %12 : vector<1x128xf32>
    %179 = arith.mulf %178, %17 : vector<1x128xf32>
    %180 = arith.negf %179 : vector<1x128xf32>
    %181 = math.exp %180 : vector<1x128xf32>
    %cst_104 = arith.constant 1.000000e+00 : f32
    %182 = vector.broadcast %cst_104 : f32 to vector<1x128xf32>
    %183 = arith.addf %182, %181 : vector<1x128xf32>
    %184 = arith.divf %182, %183 : vector<1x128xf32>
    %185 = arith.mulf %184, %17 : vector<1x128xf32>
    %186 = arith.subf %185, %15 : vector<1x128xf32>
    %187 = vector.extract_strided_slice %186 {offsets = [0, 0], sizes = [1, 32], strides = [1, 1]} : vector<1x128xf32> to vector<1x32xf32>
    %188 = vector.extract_strided_slice %186 {offsets = [0, 32], sizes = [1, 32], strides = [1, 1]} : vector<1x128xf32> to vector<1x32xf32>
    %189 = vector.extract_strided_slice %186 {offsets = [0, 64], sizes = [1, 32], strides = [1, 1]} : vector<1x128xf32> to vector<1x32xf32>
    %190 = vector.extract_strided_slice %186 {offsets = [0, 96], sizes = [1, 32], strides = [1, 1]} : vector<1x128xf32> to vector<1x32xf32>
    %191 = arith.mulf %188, %170 : vector<1x32xf32>
    %192 = arith.mulf %187, %189 : vector<1x32xf32>
    %193 = arith.addf %191, %192 : vector<1x32xf32>
    %194 = math.tanh %193 : vector<1x32xf32>
    %195 = arith.mulf %190, %194 : vector<1x32xf32>
    %196 = arith.mulf %195, %13 : vector<1x32xf32>
    %cst_105 = arith.constant dense<0.000000e+00> : vector<1xf32>
    %197 = vector.multi_reduction <add>, %196, %cst_105 [1] : vector<1x32xf32> to vector<1xf32>
    %198 = vector.shape_cast %197 : vector<1xf32> to vector<1x1xf32>
    %199 = arith.index_cast %168 : i32 to index
    %c0_106 = arith.constant 0 : index
    %200 = vector.load %arg8[%199, %c0_106] : memref<8x1xf32, #tpu.memory_space<vmem>>, vector<1x1xf32>
    %201 = arith.addf %198, %200 : vector<1x1xf32>
    %202 = arith.addf %201, %14 : vector<1x1xf32>
    %203 = arith.negf %202 : vector<1x1xf32>
    %204 = math.exp %203 : vector<1x1xf32>
    %cst_107 = arith.constant 1.000000e+00 : f32
    %205 = vector.broadcast %cst_107 : f32 to vector<1x1xf32>
    %206 = arith.addf %205, %204 : vector<1x1xf32>
    %207 = arith.divf %205, %206 : vector<1x1xf32>
    %c0_108 = arith.constant 0 : index
    %c0_109 = arith.constant 0 : index
    %208 = vector.load %arg6[%c0_108, %c0_109] : memref<8x128xf32, #tpu.memory_space<vmem>>, vector<1x32xf32>
    tpu.vector_store %arg6[%c0_108, %c0_109], %195 {strides = array<i32>} : memref<8x128xf32, #tpu.memory_space<vmem>>, vector<1x32xf32>,
    %c1_110 = arith.constant 1 : index
    %c0_111 = arith.constant 0 : index
    %209 = vector.load %arg6[%c1_110, %c0_111] : memref<8x128xf32, #tpu.memory_space<vmem>>, vector<1x32xf32>
    tpu.vector_store %arg6[%c1_110, %c0_111], %193 {strides = array<i32>} : memref<8x128xf32, #tpu.memory_space<vmem>>, vector<1x32xf32>,
    %c2_112 = arith.constant 2 : index
    %c0_113 = arith.constant 0 : index
    %210 = vector.load %arg6[%c2_112, %c0_113] : memref<8x128xf32, #tpu.memory_space<vmem>>, vector<1x1xf32>
    tpu.vector_store %arg6[%c2_112, %c0_113], %207 {strides = array<i32>} : memref<8x128xf32, #tpu.memory_space<vmem>>, vector<1x1xf32>,
    %c0_114 = arith.constant 0 : index
    %c0_115 = arith.constant 0 : index
    %211 = vector.load %arg6[%c0_114, %c0_115] : memref<8x128xf32, #tpu.memory_space<vmem>>, vector<8x128xf32>
    %212 = arith.index_cast %168 : i32 to index
    %c0_116 = arith.constant 0 : index
    %c0_117 = arith.constant 0 : index
    %213 = vector.load %arg5[%212, %c0_116, %c0_117] : memref<8x8x128xf32, #tpu.memory_space<vmem>>, vector<1x8x128xf32>
    %214 = vector.shape_cast %213 : vector<1x8x128xf32> to vector<8x128xf32>
    %215 = vector.shape_cast %211 : vector<8x128xf32> to vector<1x8x128xf32>
    tpu.vector_store %arg5[%212, %c0_116, %c0_117], %215 {strides = array<i32>} : memref<8x8x128xf32, #tpu.memory_space<vmem>>, vector<1x8x128xf32>,
    %c4_i32 = arith.constant 4 : i32
    %c1_i32_118 = arith.constant 1 : i32
    %216 = arith.muli %c4_i32, %c1_i32_118 : i32
    %c0_i32_119 = arith.constant 0 : i32
    %217 = arith.addi %c0_i32_119, %216 : i32
    %c0_120 = arith.constant 0 : index
    %c0_121 = arith.constant 0 : index
    %218 = vector.load %arg6[%c0_120, %c0_121] : memref<8x128xf32, #tpu.memory_space<vmem>>, vector<1x128xf32>
    %c1_122 = arith.constant 1 : index
    %c0_123 = arith.constant 0 : index
    %219 = vector.load %arg6[%c1_122, %c0_123] : memref<8x128xf32, #tpu.memory_space<vmem>>, vector<1x32xf32>
    %c2_124 = arith.constant 2 : index
    %c0_125 = arith.constant 0 : index
    %220 = vector.load %arg6[%c2_124, %c0_125] : memref<8x128xf32, #tpu.memory_space<vmem>>, vector<1x1xf32>
    %221 = arith.index_cast %217 : i32 to index
    %c0_126 = arith.constant 0 : index
    %222 = vector.load %arg7[%221, %c0_126] : memref<8x128xf32, #tpu.memory_space<vmem>>, vector<1x128xf32>
    %223 = vector.broadcast %220 : vector<1x1xf32> to vector<1x128xf32>
    %224 = arith.mulf %223, %222 : vector<1x128xf32>
    %cst_127 = arith.constant dense<0.000000e+00> : vector<1x128xf32>
    %225 = tpu.matmul %218, %11, %cst_127 {dimension_numbers = #tpu.dot_dimension_numbers<[1], [0], [0], [1], [0, 0, 1, 1], [], []>} : vector<1x128xf32>, vector<128x128xf32>, vector<1x128xf32> -> vector<1x128xf32>
    %226 = arith.addf %224, %225 : vector<1x128xf32>
    %227 = arith.addf %226, %12 : vector<1x128xf32>
    %228 = arith.mulf %227, %17 : vector<1x128xf32>
    %229 = arith.negf %228 : vector<1x128xf32>
    %230 = math.exp %229 : vector<1x128xf32>
    %cst_128 = arith.constant 1.000000e+00 : f32
    %231 = vector.broadcast %cst_128 : f32 to vector<1x128xf32>
    %232 = arith.addf %231, %230 : vector<1x128xf32>
    %233 = arith.divf %231, %232 : vector<1x128xf32>
    %234 = arith.mulf %233, %17 : vector<1x128xf32>
    %235 = arith.subf %234, %15 : vector<1x128xf32>
    %236 = vector.extract_strided_slice %235 {offsets = [0, 0], sizes = [1, 32], strides = [1, 1]} : vector<1x128xf32> to vector<1x32xf32>
    %237 = vector.extract_strided_slice %235 {offsets = [0, 32], sizes = [1, 32], strides = [1, 1]} : vector<1x128xf32> to vector<1x32xf32>
    %238 = vector.extract_strided_slice %235 {offsets = [0, 64], sizes = [1, 32], strides = [1, 1]} : vector<1x128xf32> to vector<1x32xf32>
    %239 = vector.extract_strided_slice %235 {offsets = [0, 96], sizes = [1, 32], strides = [1, 1]} : vector<1x128xf32> to vector<1x32xf32>
    %240 = arith.mulf %237, %219 : vector<1x32xf32>
    %241 = arith.mulf %236, %238 : vector<1x32xf32>
    %242 = arith.addf %240, %241 : vector<1x32xf32>
    %243 = math.tanh %242 : vector<1x32xf32>
    %244 = arith.mulf %239, %243 : vector<1x32xf32>
    %245 = arith.mulf %244, %13 : vector<1x32xf32>
    %cst_129 = arith.constant dense<0.000000e+00> : vector<1xf32>
    %246 = vector.multi_reduction <add>, %245, %cst_129 [1] : vector<1x32xf32> to vector<1xf32>
    %247 = vector.shape_cast %246 : vector<1xf32> to vector<1x1xf32>
    %248 = arith.index_cast %217 : i32 to index
    %c0_130 = arith.constant 0 : index
    %249 = vector.load %arg8[%248, %c0_130] : memref<8x1xf32, #tpu.memory_space<vmem>>, vector<1x1xf32>
    %250 = arith.addf %247, %249 : vector<1x1xf32>
    %251 = arith.addf %250, %14 : vector<1x1xf32>
    %252 = arith.negf %251 : vector<1x1xf32>
    %253 = math.exp %252 : vector<1x1xf32>
    %cst_131 = arith.constant 1.000000e+00 : f32
    %254 = vector.broadcast %cst_131 : f32 to vector<1x1xf32>
    %255 = arith.addf %254, %253 : vector<1x1xf32>
    %256 = arith.divf %254, %255 : vector<1x1xf32>
    %c0_132 = arith.constant 0 : index
    %c0_133 = arith.constant 0 : index
    %257 = vector.load %arg6[%c0_132, %c0_133] : memref<8x128xf32, #tpu.memory_space<vmem>>, vector<1x32xf32>
    tpu.vector_store %arg6[%c0_132, %c0_133], %244 {strides = array<i32>} : memref<8x128xf32, #tpu.memory_space<vmem>>, vector<1x32xf32>,
    %c1_134 = arith.constant 1 : index
    %c0_135 = arith.constant 0 : index
    %258 = vector.load %arg6[%c1_134, %c0_135] : memref<8x128xf32, #tpu.memory_space<vmem>>, vector<1x32xf32>
    tpu.vector_store %arg6[%c1_134, %c0_135], %242 {strides = array<i32>} : memref<8x128xf32, #tpu.memory_space<vmem>>, vector<1x32xf32>,
    %c2_136 = arith.constant 2 : index
    %c0_137 = arith.constant 0 : index
    %259 = vector.load %arg6[%c2_136, %c0_137] : memref<8x128xf32, #tpu.memory_space<vmem>>, vector<1x1xf32>
    tpu.vector_store %arg6[%c2_136, %c0_137], %256 {strides = array<i32>} : memref<8x128xf32, #tpu.memory_space<vmem>>, vector<1x1xf32>,
    %c0_138 = arith.constant 0 : index
    %c0_139 = arith.constant 0 : index
    %260 = vector.load %arg6[%c0_138, %c0_139] : memref<8x128xf32, #tpu.memory_space<vmem>>, vector<8x128xf32>
    %261 = arith.index_cast %217 : i32 to index
    %c0_140 = arith.constant 0 : index
    %c0_141 = arith.constant 0 : index
    %262 = vector.load %arg5[%261, %c0_140, %c0_141] : memref<8x8x128xf32, #tpu.memory_space<vmem>>, vector<1x8x128xf32>
    %263 = vector.shape_cast %262 : vector<1x8x128xf32> to vector<8x128xf32>
    %264 = vector.shape_cast %260 : vector<8x128xf32> to vector<1x8x128xf32>
    tpu.vector_store %arg5[%261, %c0_140, %c0_141], %264 {strides = array<i32>} : memref<8x8x128xf32, #tpu.memory_space<vmem>>, vector<1x8x128xf32>,
    %c5_i32 = arith.constant 5 : i32
    %c1_i32_142 = arith.constant 1 : i32
    %265 = arith.muli %c5_i32, %c1_i32_142 : i32
    %c0_i32_143 = arith.constant 0 : i32
    %266 = arith.addi %c0_i32_143, %265 : i32
    %c0_144 = arith.constant 0 : index
    %c0_145 = arith.constant 0 : index
    %267 = vector.load %arg6[%c0_144, %c0_145] : memref<8x128xf32, #tpu.memory_space<vmem>>, vector<1x128xf32>
    %c1_146 = arith.constant 1 : index
    %c0_147 = arith.constant 0 : index
    %268 = vector.load %arg6[%c1_146, %c0_147] : memref<8x128xf32, #tpu.memory_space<vmem>>, vector<1x32xf32>
    %c2_148 = arith.constant 2 : index
    %c0_149 = arith.constant 0 : index
    %269 = vector.load %arg6[%c2_148, %c0_149] : memref<8x128xf32, #tpu.memory_space<vmem>>, vector<1x1xf32>
    %270 = arith.index_cast %266 : i32 to index
    %c0_150 = arith.constant 0 : index
    %271 = vector.load %arg7[%270, %c0_150] : memref<8x128xf32, #tpu.memory_space<vmem>>, vector<1x128xf32>
    %272 = vector.broadcast %269 : vector<1x1xf32> to vector<1x128xf32>
    %273 = arith.mulf %272, %271 : vector<1x128xf32>
    %cst_151 = arith.constant dense<0.000000e+00> : vector<1x128xf32>
    %274 = tpu.matmul %267, %11, %cst_151 {dimension_numbers = #tpu.dot_dimension_numbers<[1], [0], [0], [1], [0, 0, 1, 1], [], []>} : vector<1x128xf32>, vector<128x128xf32>, vector<1x128xf32> -> vector<1x128xf32>
    %275 = arith.addf %273, %274 : vector<1x128xf32>
    %276 = arith.addf %275, %12 : vector<1x128xf32>
    %277 = arith.mulf %276, %17 : vector<1x128xf32>
    %278 = arith.negf %277 : vector<1x128xf32>
    %279 = math.exp %278 : vector<1x128xf32>
    %cst_152 = arith.constant 1.000000e+00 : f32
    %280 = vector.broadcast %cst_152 : f32 to vector<1x128xf32>
    %281 = arith.addf %280, %279 : vector<1x128xf32>
    %282 = arith.divf %280, %281 : vector<1x128xf32>
    %283 = arith.mulf %282, %17 : vector<1x128xf32>
    %284 = arith.subf %283, %15 : vector<1x128xf32>
    %285 = vector.extract_strided_slice %284 {offsets = [0, 0], sizes = [1, 32], strides = [1, 1]} : vector<1x128xf32> to vector<1x32xf32>
    %286 = vector.extract_strided_slice %284 {offsets = [0, 32], sizes = [1, 32], strides = [1, 1]} : vector<1x128xf32> to vector<1x32xf32>
    %287 = vector.extract_strided_slice %284 {offsets = [0, 64], sizes = [1, 32], strides = [1, 1]} : vector<1x128xf32> to vector<1x32xf32>
    %288 = vector.extract_strided_slice %284 {offsets = [0, 96], sizes = [1, 32], strides = [1, 1]} : vector<1x128xf32> to vector<1x32xf32>
    %289 = arith.mulf %286, %268 : vector<1x32xf32>
    %290 = arith.mulf %285, %287 : vector<1x32xf32>
    %291 = arith.addf %289, %290 : vector<1x32xf32>
    %292 = math.tanh %291 : vector<1x32xf32>
    %293 = arith.mulf %288, %292 : vector<1x32xf32>
    %294 = arith.mulf %293, %13 : vector<1x32xf32>
    %cst_153 = arith.constant dense<0.000000e+00> : vector<1xf32>
    %295 = vector.multi_reduction <add>, %294, %cst_153 [1] : vector<1x32xf32> to vector<1xf32>
    %296 = vector.shape_cast %295 : vector<1xf32> to vector<1x1xf32>
    %297 = arith.index_cast %266 : i32 to index
    %c0_154 = arith.constant 0 : index
    %298 = vector.load %arg8[%297, %c0_154] : memref<8x1xf32, #tpu.memory_space<vmem>>, vector<1x1xf32>
    %299 = arith.addf %296, %298 : vector<1x1xf32>
    %300 = arith.addf %299, %14 : vector<1x1xf32>
    %301 = arith.negf %300 : vector<1x1xf32>
    %302 = math.exp %301 : vector<1x1xf32>
    %cst_155 = arith.constant 1.000000e+00 : f32
    %303 = vector.broadcast %cst_155 : f32 to vector<1x1xf32>
    %304 = arith.addf %303, %302 : vector<1x1xf32>
    %305 = arith.divf %303, %304 : vector<1x1xf32>
    %c0_156 = arith.constant 0 : index
    %c0_157 = arith.constant 0 : index
    %306 = vector.load %arg6[%c0_156, %c0_157] : memref<8x128xf32, #tpu.memory_space<vmem>>, vector<1x32xf32>
    tpu.vector_store %arg6[%c0_156, %c0_157], %293 {strides = array<i32>} : memref<8x128xf32, #tpu.memory_space<vmem>>, vector<1x32xf32>,
    %c1_158 = arith.constant 1 : index
    %c0_159 = arith.constant 0 : index
    %307 = vector.load %arg6[%c1_158, %c0_159] : memref<8x128xf32, #tpu.memory_space<vmem>>, vector<1x32xf32>
    tpu.vector_store %arg6[%c1_158, %c0_159], %291 {strides = array<i32>} : memref<8x128xf32, #tpu.memory_space<vmem>>, vector<1x32xf32>,
    %c2_160 = arith.constant 2 : index
    %c0_161 = arith.constant 0 : index
    %308 = vector.load %arg6[%c2_160, %c0_161] : memref<8x128xf32, #tpu.memory_space<vmem>>, vector<1x1xf32>
    tpu.vector_store %arg6[%c2_160, %c0_161], %305 {strides = array<i32>} : memref<8x128xf32, #tpu.memory_space<vmem>>, vector<1x1xf32>,
    %c0_162 = arith.constant 0 : index
    %c0_163 = arith.constant 0 : index
    %309 = vector.load %arg6[%c0_162, %c0_163] : memref<8x128xf32, #tpu.memory_space<vmem>>, vector<8x128xf32>
    %310 = arith.index_cast %266 : i32 to index
    %c0_164 = arith.constant 0 : index
    %c0_165 = arith.constant 0 : index
    %311 = vector.load %arg5[%310, %c0_164, %c0_165] : memref<8x8x128xf32, #tpu.memory_space<vmem>>, vector<1x8x128xf32>
    %312 = vector.shape_cast %311 : vector<1x8x128xf32> to vector<8x128xf32>
    %313 = vector.shape_cast %309 : vector<8x128xf32> to vector<1x8x128xf32>
    tpu.vector_store %arg5[%310, %c0_164, %c0_165], %313 {strides = array<i32>} : memref<8x8x128xf32, #tpu.memory_space<vmem>>, vector<1x8x128xf32>,
    %c6_i32 = arith.constant 6 : i32
    %c1_i32_166 = arith.constant 1 : i32
    %314 = arith.muli %c6_i32, %c1_i32_166 : i32
    %c0_i32_167 = arith.constant 0 : i32
    %315 = arith.addi %c0_i32_167, %314 : i32
    %c0_168 = arith.constant 0 : index
    %c0_169 = arith.constant 0 : index
    %316 = vector.load %arg6[%c0_168, %c0_169] : memref<8x128xf32, #tpu.memory_space<vmem>>, vector<1x128xf32>
    %c1_170 = arith.constant 1 : index
    %c0_171 = arith.constant 0 : index
    %317 = vector.load %arg6[%c1_170, %c0_171] : memref<8x128xf32, #tpu.memory_space<vmem>>, vector<1x32xf32>
    %c2_172 = arith.constant 2 : index
    %c0_173 = arith.constant 0 : index
    %318 = vector.load %arg6[%c2_172, %c0_173] : memref<8x128xf32, #tpu.memory_space<vmem>>, vector<1x1xf32>
    %319 = arith.index_cast %315 : i32 to index
    %c0_174 = arith.constant 0 : index
    %320 = vector.load %arg7[%319, %c0_174] : memref<8x128xf32, #tpu.memory_space<vmem>>, vector<1x128xf32>
    %321 = vector.broadcast %318 : vector<1x1xf32> to vector<1x128xf32>
    %322 = arith.mulf %321, %320 : vector<1x128xf32>
    %cst_175 = arith.constant dense<0.000000e+00> : vector<1x128xf32>
    %323 = tpu.matmul %316, %11, %cst_175 {dimension_numbers = #tpu.dot_dimension_numbers<[1], [0], [0], [1], [0, 0, 1, 1], [], []>} : vector<1x128xf32>, vector<128x128xf32>, vector<1x128xf32> -> vector<1x128xf32>
    %324 = arith.addf %322, %323 : vector<1x128xf32>
    %325 = arith.addf %324, %12 : vector<1x128xf32>
    %326 = arith.mulf %325, %17 : vector<1x128xf32>
    %327 = arith.negf %326 : vector<1x128xf32>
    %328 = math.exp %327 : vector<1x128xf32>
    %cst_176 = arith.constant 1.000000e+00 : f32
    %329 = vector.broadcast %cst_176 : f32 to vector<1x128xf32>
    %330 = arith.addf %329, %328 : vector<1x128xf32>
    %331 = arith.divf %329, %330 : vector<1x128xf32>
    %332 = arith.mulf %331, %17 : vector<1x128xf32>
    %333 = arith.subf %332, %15 : vector<1x128xf32>
    %334 = vector.extract_strided_slice %333 {offsets = [0, 0], sizes = [1, 32], strides = [1, 1]} : vector<1x128xf32> to vector<1x32xf32>
    %335 = vector.extract_strided_slice %333 {offsets = [0, 32], sizes = [1, 32], strides = [1, 1]} : vector<1x128xf32> to vector<1x32xf32>
    %336 = vector.extract_strided_slice %333 {offsets = [0, 64], sizes = [1, 32], strides = [1, 1]} : vector<1x128xf32> to vector<1x32xf32>
    %337 = vector.extract_strided_slice %333 {offsets = [0, 96], sizes = [1, 32], strides = [1, 1]} : vector<1x128xf32> to vector<1x32xf32>
    %338 = arith.mulf %335, %317 : vector<1x32xf32>
    %339 = arith.mulf %334, %336 : vector<1x32xf32>
    %340 = arith.addf %338, %339 : vector<1x32xf32>
    %341 = math.tanh %340 : vector<1x32xf32>
    %342 = arith.mulf %337, %341 : vector<1x32xf32>
    %343 = arith.mulf %342, %13 : vector<1x32xf32>
    %cst_177 = arith.constant dense<0.000000e+00> : vector<1xf32>
    %344 = vector.multi_reduction <add>, %343, %cst_177 [1] : vector<1x32xf32> to vector<1xf32>
    %345 = vector.shape_cast %344 : vector<1xf32> to vector<1x1xf32>
    %346 = arith.index_cast %315 : i32 to index
    %c0_178 = arith.constant 0 : index
    %347 = vector.load %arg8[%346, %c0_178] : memref<8x1xf32, #tpu.memory_space<vmem>>, vector<1x1xf32>
    %348 = arith.addf %345, %347 : vector<1x1xf32>
    %349 = arith.addf %348, %14 : vector<1x1xf32>
    %350 = arith.negf %349 : vector<1x1xf32>
    %351 = math.exp %350 : vector<1x1xf32>
    %cst_179 = arith.constant 1.000000e+00 : f32
    %352 = vector.broadcast %cst_179 : f32 to vector<1x1xf32>
    %353 = arith.addf %352, %351 : vector<1x1xf32>
    %354 = arith.divf %352, %353 : vector<1x1xf32>
    %c0_180 = arith.constant 0 : index
    %c0_181 = arith.constant 0 : index
    %355 = vector.load %arg6[%c0_180, %c0_181] : memref<8x128xf32, #tpu.memory_space<vmem>>, vector<1x32xf32>
    tpu.vector_store %arg6[%c0_180, %c0_181], %342 {strides = array<i32>} : memref<8x128xf32, #tpu.memory_space<vmem>>, vector<1x32xf32>,
    %c1_182 = arith.constant 1 : index
    %c0_183 = arith.constant 0 : index
    %356 = vector.load %arg6[%c1_182, %c0_183] : memref<8x128xf32, #tpu.memory_space<vmem>>, vector<1x32xf32>
    tpu.vector_store %arg6[%c1_182, %c0_183], %340 {strides = array<i32>} : memref<8x128xf32, #tpu.memory_space<vmem>>, vector<1x32xf32>,
    %c2_184 = arith.constant 2 : index
    %c0_185 = arith.constant 0 : index
    %357 = vector.load %arg6[%c2_184, %c0_185] : memref<8x128xf32, #tpu.memory_space<vmem>>, vector<1x1xf32>
    tpu.vector_store %arg6[%c2_184, %c0_185], %354 {strides = array<i32>} : memref<8x128xf32, #tpu.memory_space<vmem>>, vector<1x1xf32>,
    %c0_186 = arith.constant 0 : index
    %c0_187 = arith.constant 0 : index
    %358 = vector.load %arg6[%c0_186, %c0_187] : memref<8x128xf32, #tpu.memory_space<vmem>>, vector<8x128xf32>
    %359 = arith.index_cast %315 : i32 to index
    %c0_188 = arith.constant 0 : index
    %c0_189 = arith.constant 0 : index
    %360 = vector.load %arg5[%359, %c0_188, %c0_189] : memref<8x8x128xf32, #tpu.memory_space<vmem>>, vector<1x8x128xf32>
    %361 = vector.shape_cast %360 : vector<1x8x128xf32> to vector<8x128xf32>
    %362 = vector.shape_cast %358 : vector<8x128xf32> to vector<1x8x128xf32>
    tpu.vector_store %arg5[%359, %c0_188, %c0_189], %362 {strides = array<i32>} : memref<8x8x128xf32, #tpu.memory_space<vmem>>, vector<1x8x128xf32>,
    %c7_i32 = arith.constant 7 : i32
    %c1_i32_190 = arith.constant 1 : i32
    %363 = arith.muli %c7_i32, %c1_i32_190 : i32
    %c0_i32_191 = arith.constant 0 : i32
    %364 = arith.addi %c0_i32_191, %363 : i32
    %c0_192 = arith.constant 0 : index
    %c0_193 = arith.constant 0 : index
    %365 = vector.load %arg6[%c0_192, %c0_193] : memref<8x128xf32, #tpu.memory_space<vmem>>, vector<1x128xf32>
    %c1_194 = arith.constant 1 : index
    %c0_195 = arith.constant 0 : index
    %366 = vector.load %arg6[%c1_194, %c0_195] : memref<8x128xf32, #tpu.memory_space<vmem>>, vector<1x32xf32>
    %c2_196 = arith.constant 2 : index
    %c0_197 = arith.constant 0 : index
    %367 = vector.load %arg6[%c2_196, %c0_197] : memref<8x128xf32, #tpu.memory_space<vmem>>, vector<1x1xf32>
    %368 = arith.index_cast %364 : i32 to index
    %c0_198 = arith.constant 0 : index
    %369 = vector.load %arg7[%368, %c0_198] : memref<8x128xf32, #tpu.memory_space<vmem>>, vector<1x128xf32>
    %370 = vector.broadcast %367 : vector<1x1xf32> to vector<1x128xf32>
    %371 = arith.mulf %370, %369 : vector<1x128xf32>
    %cst_199 = arith.constant dense<0.000000e+00> : vector<1x128xf32>
    %372 = tpu.matmul %365, %11, %cst_199 {dimension_numbers = #tpu.dot_dimension_numbers<[1], [0], [0], [1], [0, 0, 1, 1], [], []>} : vector<1x128xf32>, vector<128x128xf32>, vector<1x128xf32> -> vector<1x128xf32>
    %373 = arith.addf %371, %372 : vector<1x128xf32>
    %374 = arith.addf %373, %12 : vector<1x128xf32>
    %375 = arith.mulf %374, %17 : vector<1x128xf32>
    %376 = arith.negf %375 : vector<1x128xf32>
    %377 = math.exp %376 : vector<1x128xf32>
    %cst_200 = arith.constant 1.000000e+00 : f32
    %378 = vector.broadcast %cst_200 : f32 to vector<1x128xf32>
    %379 = arith.addf %378, %377 : vector<1x128xf32>
    %380 = arith.divf %378, %379 : vector<1x128xf32>
    %381 = arith.mulf %380, %17 : vector<1x128xf32>
    %382 = arith.subf %381, %15 : vector<1x128xf32>
    %383 = vector.extract_strided_slice %382 {offsets = [0, 0], sizes = [1, 32], strides = [1, 1]} : vector<1x128xf32> to vector<1x32xf32>
    %384 = vector.extract_strided_slice %382 {offsets = [0, 32], sizes = [1, 32], strides = [1, 1]} : vector<1x128xf32> to vector<1x32xf32>
    %385 = vector.extract_strided_slice %382 {offsets = [0, 64], sizes = [1, 32], strides = [1, 1]} : vector<1x128xf32> to vector<1x32xf32>
    %386 = vector.extract_strided_slice %382 {offsets = [0, 96], sizes = [1, 32], strides = [1, 1]} : vector<1x128xf32> to vector<1x32xf32>
    %387 = arith.mulf %384, %366 : vector<1x32xf32>
    %388 = arith.mulf %383, %385 : vector<1x32xf32>
    %389 = arith.addf %387, %388 : vector<1x32xf32>
    %390 = math.tanh %389 : vector<1x32xf32>
    %391 = arith.mulf %386, %390 : vector<1x32xf32>
    %392 = arith.mulf %391, %13 : vector<1x32xf32>
    %cst_201 = arith.constant dense<0.000000e+00> : vector<1xf32>
    %393 = vector.multi_reduction <add>, %392, %cst_201 [1] : vector<1x32xf32> to vector<1xf32>
    %394 = vector.shape_cast %393 : vector<1xf32> to vector<1x1xf32>
    %395 = arith.index_cast %364 : i32 to index
    %c0_202 = arith.constant 0 : index
    %396 = vector.load %arg8[%395, %c0_202] : memref<8x1xf32, #tpu.memory_space<vmem>>, vector<1x1xf32>
    %397 = arith.addf %394, %396 : vector<1x1xf32>
    %398 = arith.addf %397, %14 : vector<1x1xf32>
    %399 = arith.negf %398 : vector<1x1xf32>
    %400 = math.exp %399 : vector<1x1xf32>
    %cst_203 = arith.constant 1.000000e+00 : f32
    %401 = vector.broadcast %cst_203 : f32 to vector<1x1xf32>
    %402 = arith.addf %401, %400 : vector<1x1xf32>
    %403 = arith.divf %401, %402 : vector<1x1xf32>
    %c0_204 = arith.constant 0 : index
    %c0_205 = arith.constant 0 : index
    %404 = vector.load %arg6[%c0_204, %c0_205] : memref<8x128xf32, #tpu.memory_space<vmem>>, vector<1x32xf32>
    tpu.vector_store %arg6[%c0_204, %c0_205], %391 {strides = array<i32>} : memref<8x128xf32, #tpu.memory_space<vmem>>, vector<1x32xf32>,
    %c1_206 = arith.constant 1 : index
    %c0_207 = arith.constant 0 : index
    %405 = vector.load %arg6[%c1_206, %c0_207] : memref<8x128xf32, #tpu.memory_space<vmem>>, vector<1x32xf32>
    tpu.vector_store %arg6[%c1_206, %c0_207], %389 {strides = array<i32>} : memref<8x128xf32, #tpu.memory_space<vmem>>, vector<1x32xf32>,
    %c2_208 = arith.constant 2 : index
    %c0_209 = arith.constant 0 : index
    %406 = vector.load %arg6[%c2_208, %c0_209] : memref<8x128xf32, #tpu.memory_space<vmem>>, vector<1x1xf32>
    tpu.vector_store %arg6[%c2_208, %c0_209], %403 {strides = array<i32>} : memref<8x128xf32, #tpu.memory_space<vmem>>, vector<1x1xf32>,
    %c0_210 = arith.constant 0 : index
    %c0_211 = arith.constant 0 : index
    %407 = vector.load %arg6[%c0_210, %c0_211] : memref<8x128xf32, #tpu.memory_space<vmem>>, vector<8x128xf32>
    %408 = arith.index_cast %364 : i32 to index
    %c0_212 = arith.constant 0 : index
    %c0_213 = arith.constant 0 : index
    %409 = vector.load %arg5[%408, %c0_212, %c0_213] : memref<8x8x128xf32, #tpu.memory_space<vmem>>, vector<1x8x128xf32>
    %410 = vector.shape_cast %409 : vector<1x8x128xf32> to vector<8x128xf32>
    %411 = vector.shape_cast %407 : vector<8x128xf32> to vector<1x8x128xf32>
    tpu.vector_store %arg5[%408, %c0_212, %c0_213], %411 {strides = array<i32>} : memref<8x8x128xf32, #tpu.memory_space<vmem>>, vector<1x8x128xf32>,
    %c8_i32 = arith.constant 8 : i32
    return
  }
}

</mosaic_0001>

<bundles_post_ra>
// kernel: tpu_custom_call.1
= control target key start
LH: loop header
LB: loop body
LE: loop exit
PB: predicated region body
PF: predicated region fallthrough
CT: control target
= control target key end

     0   :  { %10 = vsyncpa [#allocation6], 0  ;;  %s2726_s0 = inlined_call_operand.hbm [shape: f32[8,256], index: 0, kind: input, shape index: {}]   ;;  %s2727_s1 = inlined_call_operand.hbm [shape: f32[8,128], index: 1, kind: input, shape index: {}]   ;;  %s2728_s2 = inlined_call_operand.hbm [shape: f32[128,128], index: 2, kind: input, shape index: {}]   ;;  %s2729_s3 = inlined_call_operand.hbm [shape: f32[128,128], index: 3, kind: input, shape index: {}]   ;;  %s2730_s4 = inlined_call_operand.vmem [shape: f32[8,128], index: 4, kind: input, shape index: {}]   ;;  %s2731_s5 = inlined_call_operand.hbm [shape: f32[8,8,128], index: 5, kind: output, shape index: {}]  }
   0x1   :  { %11 = vsyncpa [#allocation9], 0 }
   0x2   :  { %12 = vsyncpa [#allocation12], 0 }
   0x3   :  { %13 = vsyncpa [#allocation7], 0  ;;  %s2278_s18 = smov [#allocation8]   ;;  %s2279_s20 = smov [#allocation5]  }
   0x4   :  { %s30_s19 = sshll.u32 %s2278_s18, 4  ;;  %s20_s21 = sshll.u32 %s2279_s20, 4  ;;  %s31_s19 = int_to_ptr.vmem [resolvable:$true] %s30_s19  ;;  %s21_s21 = int_to_ptr.vmem [resolvable:$true] %s20_s21 }
   0x5   :  { %s2160_s24 = scalar_lea.hbm %s2727_s1, 128 }
   0x6   :  { %p2161_p0 = scmp.ne.s32.totalorder %s2727_s1, %s2160_s24  ;;  %p2164_p1 = scmp.lt.u32.totalorder %s2160_s24, %s2727_s1 }
   0x8   :  { %p2166_p2 = pnand %p2164_p1, %p2161_p0 }
   0xa   :  { %2169 = shalt.err (!%p2166_p2)
}
   0xb   :  { %s2170_s29 = scalar_lea.vmem %s31_s19, 128  ;;  %p2175_p4 = scmp.lt.s32.totalorder %s31_s19, %s31_s19 }
   0xc   :  { %p2171_p3 = scmp.ne.s32.totalorder %s31_s19, %s2170_s29  ;;  %p2176_p5 = scmp.lt.s32.totalorder %s2170_s29, %s2170_s29 }
   0xe   :  { %p2177_p6 = por %p2176_p5, %p2175_p4 }
  0x10   :  { %p2178_p7 = pnand %p2177_p6, %p2171_p3 }
  0x12   :  { %2181 = shalt.err (!%p2178_p7)
}
  0x13   :  { %33 = dma.hbm_to_vmem [thread:$0]  %s2727_s1, 128, %s31_s19, [#allocation9]  }
  0x14   :  { %s2182_s9 = scalar_lea.hbm %s2726_s0, 256 }
  0x15   :  { %p2183_p8 = scmp.ne.s32.totalorder %s2726_s0, %s2182_s9  ;;  %p2186_p9 = scmp.lt.u32.totalorder %s2182_s9, %s2726_s0 }
  0x17   :  { %p2188_p10 = pnand %p2186_p9, %p2183_p8 }
  0x19   :  { %2191 = shalt.err (!%p2188_p10)
}
  0x1a   :  { %s2192_s14 = scalar_lea.vmem %s21_s21, 256  ;;  %p2197_p12 = scmp.lt.s32.totalorder %s21_s21, %s21_s21 }
  0x1b   :  { %p2193_p11 = scmp.ne.s32.totalorder %s21_s21, %s2192_s14  ;;  %p2198_p13 = scmp.lt.s32.totalorder %s2192_s14, %s2192_s14 }
  0x1d   :  { %p2199_p0 = por %p2198_p13, %p2197_p12 }
  0x1f   :  { %p2200_p1 = pnand %p2199_p0, %p2193_p11 }
  0x21   :  { %2203 = shalt.err (!%p2200_p1)
}
  0x22   :  { %23 = dma.hbm_to_vmem [thread:$0]  %s2726_s0, 256, %s21_s21, [#allocation6]  }
  0x23   :  { %s2280_s16 = smov [#allocation10]   ;;  %s2204_s20 = scalar_lea.hbm %s2728_s2, 2048 }
  0x24   :  { %s39_s17 = sshll.u32 %s2280_s16, 4  ;;  %p2205_p2 = scmp.ne.s32.totalorder %s2728_s2, %s2204_s20  ;;  %s40_s17 = int_to_ptr.vmem [resolvable:$true] %s39_s17 }
  0x25   :  { %p2208_p3 = scmp.lt.u32.totalorder %s2204_s20, %s2728_s2 }
  0x27   :  { %p2210_p4 = pnand %p2208_p3, %p2205_p2 }
  0x29   :  { %2213 = shalt.err (!%p2210_p4)
}
  0x2a   :  { %s2214_s26 = scalar_lea.vmem %s40_s17, 2048  ;;  %p2219_p6 = scmp.lt.s32.totalorder %s40_s17, %s40_s17 }
  0x2b   :  { %p2215_p5 = scmp.ne.s32.totalorder %s40_s17, %s2214_s26  ;;  %p2220_p7 = scmp.lt.s32.totalorder %s2214_s26, %s2214_s26 }
  0x2d   :  { %p2221_p8 = por %p2220_p7, %p2219_p6 }
  0x2f   :  { %p2222_p9 = pnand %p2221_p8, %p2215_p5 }
  0x31   :  { %2225 = shalt.err (!%p2222_p9)
}
  0x32   :  { %s2281_s0 = smov 128   ;;  %s2282_s21 = smov 8  }
  0x33   :  { %45 = dma.hbm_to_vmem [thread:$0]  %s2728_s2, 2048, %s40_s17, [#allocation9], %s2281_s0, %s2281_s0, %s2282_s21  }
  0x34   :  { %s2283_s29 = smov [#allocation11]   ;;  %s2226_s8 = scalar_lea.hbm %s2729_s3, 2048 }
  0x35   :  { %s51_s30 = sshll.u32 %s2283_s29, 4  ;;  %p2227_p10 = scmp.ne.s32.totalorder %s2729_s3, %s2226_s8  ;;  %s52_s30 = int_to_ptr.vmem [resolvable:$true] %s51_s30 }
  0x36   :  { %p2230_p11 = scmp.lt.u32.totalorder %s2226_s8, %s2729_s3 }
  0x38   :  { %p2232_p12 = pnand %p2230_p11, %p2227_p10 }
  0x3a   :  { %2235 = shalt.err (!%p2232_p12)
}
  0x3b   :  { %s2236_s13 = scalar_lea.vmem %s52_s30, 2048  ;;  %p2241_p0 = scmp.lt.s32.totalorder %s52_s30, %s52_s30 }
  0x3c   :  { %p2237_p13 = scmp.ne.s32.totalorder %s52_s30, %s2236_s13  ;;  %p2242_p1 = scmp.lt.s32.totalorder %s2236_s13, %s2236_s13 }
  0x3e   :  { %p2243_p2 = por %p2242_p1, %p2241_p0 }
  0x40   :  { %p2244_p3 = pnand %p2243_p2, %p2237_p13 }
  0x42   :  { %2247 = shalt.err (!%p2244_p3)
}
  0x43   :  { %57 = dma.hbm_to_vmem [thread:$0]  %s2729_s3, 2048, %s52_s30, [#allocation12], %s2281_s0, %s2281_s0, %s2282_s21  }
  0x44   :  { %2270 = dma.done.wait [#allocation6], 256  }
  0x45   :  { %2271 = vsyncadd [#allocation6], 4294967040 }
  0x46   :  { %2272 = dma.done.wait [#allocation9], 2176  }
  0x47   :  { %2273 = vsyncadd [#allocation9], 4294965120 }
  0x48   :  { %2274 = dma.done.wait [#allocation12], 2048  }
  0x49   :  { %2275 = vsyncadd [#allocation12], 4294965248  ;;  %v2284_v0 = vmov 0.0|0.0   ;;  %vm2285_vm0 = vmmov 0   ;;  %v2286_v1 = vmov 0.0   ;;  %v2287_v2 = vmov 0  }
  0x4a   :  { %1847 = vmatprep.subr.bf16.mxu0 %v2284_v0  ;;  %1871 = vmatprep.subr.bf16.mxu1 %v2284_v0  ;;  %v73_v3 = vld [vmem:[#allocation10] sm:$0xff]  ;;  %v74_v4 = vld [vmem:[#allocation10 + $0x8] sm:$0xff]  ;;  %v75_v5 = vld [vmem:[#allocation10 + $0x10] sm:$0xff]  ;;  %s2288_s3 = smov 32   ;;  %s2289_s18 = smov 64   ;;  %vm315_vm1 = vcmask 253952  }
  0x4b   :  { %1564 = vmatprep.mubr.msk.f32.mxu0 %vm2285_vm0, %v2286_v1  ;;  %1599 = vmatprep.mubr.msk.f32.mxu1 %vm2285_vm0, %v2286_v1  ;;  %v1848_v6 = vpack.c.bf16 %v74_v4, %v73_v3  ;;  %v76_v7 = vld [vmem:[#allocation10 + $0x18] sm:$0xff]  ;;  %v171_v8 = vld [vmem:[#allocation11] sm:$0xff]  ;;  %v172_v9 = vld [vmem:[#allocation11 + $0x8] sm:$0xff]  ;;  %s2290_s22 = smov 96   ;;  %vm169_vm2 = vcmask 7168   ;;  %vm338_vm3 = vcmask 0  }
  0x4c   :  { %2077 = vset.pattern.permute.xlu0 %v2287_v2  ;;  %2078 = vset.pattern.permute.xlu1 %v2287_v2  ;;  %v1851_v10 = vpack.c.bf16 %v76_v7, %v75_v5  ;;  %v2382_v11 = vpack.c.bf16 %v172_v9, %v171_v8  ;;  %v173_v12 = vld [vmem:[#allocation11 + $0x10] sm:$0xff]  ;;  %v174_v13 = vld [vmem:[#allocation11 + $0x18] sm:$0xff]  ;;  %v77_v14 = vld [vmem:[#allocation10 + $0x20] sm:$0xff] }
  0x4d   :  { %1849 = vmatpush3.bf16.msra.mxu0 %v1848_v6  ;;  %v78_v15 = vld [vmem:[#allocation10 + $0x28] sm:$0xff]  ;;  %v2386_v16 = vpack.c.bf16 %v174_v13, %v173_v12  ;;  %v175_v17 = vld [vmem:[#allocation11 + $0x20] sm:$0xff]  ;;  %v79_v20 = vld [vmem:[#allocation10 + $0x30] sm:$0xff] }
  0x4e   :  { %1850 = vmatprep.subr.bf16.mxu0 %v2284_v0  ;;  %1873 = vmatpush3.bf16.msra.mxu1 %v2382_v11  ;;  %v176_v18 = vld [vmem:[#allocation11 + $0x28] sm:$0xff]  ;;  %v1854_v19 = vpack.c.bf16 %v78_v15, %v77_v14  ;;  %v80_v21 = vld [vmem:[#allocation10 + $0x38] sm:$0xff]  ;;  %v177_v23 = vld [vmem:[#allocation11 + $0x30] sm:$0xff] }
  0x4f   :  { %1874 = vmatprep.subr.bf16.mxu1 %v2284_v0  ;;  %v2391_v22 = vpack.c.bf16 %v176_v18, %v175_v17  ;;  %v178_v24 = vld [vmem:[#allocation11 + $0x38] sm:$0xff]  ;;  %v1857_v25 = vpack.c.bf16 %v80_v21, %v79_v20  ;;  %v81_v27 = vld [vmem:[#allocation10 + $0x40] sm:$0xff]  ;;  %v82_v28 = vld [vmem:[#allocation10 + $0x48] sm:$0xff] }
  0x50   :  { %v192_v26 = vld [vmem:[#allocation8] sm:$0xff]  ;;  %v2396_v29 = vpack.c.bf16 %v178_v24, %v177_v23  ;;  %v179_v30 = vld [vmem:[#allocation11 + $0x40] sm:$0xff]  ;;  %v180_v31 = vld [vmem:[#allocation11 + $0x48] sm:$0xff]  ;;  %v1860_v32 = vpack.c.bf16 %v82_v28, %v81_v27 }
  0x51   :  { %1852 = vmatpush3.bf16.msra.mxu0 %v1851_v10  ;;  %193 = vst [vmem:[#allocation2] sm:$0xff] %v192_v26  ;;  %v83_v33 = vld [vmem:[#allocation10 + $0x50] sm:$0xff]  ;;  %v84_v34 = vld [vmem:[#allocation10 + $0x58] sm:$0xff]  ;;  %v2401_v35 = vpack.c.bf16 %v180_v31, %v179_v30  ;;  %v85_v41 = vld [vmem:[#allocation10 + $0x60] sm:$0xff] }
  0x52   :  { %1853 = vmatprep.subr.bf16.mxu0 %v2284_v0  ;;  %1876 = vmatpush3.bf16.msra.mxu1 %v2386_v16  ;;  %v181_v36 = vld [vmem:[#allocation11 + $0x50] sm:$0xff]  ;;  %v182_v37 = vld [vmem:[#allocation11 + $0x58] sm:$0xff]  ;;  %v1863_v38 = vpack.c.bf16 %v84_v34, %v83_v33  ;;  %v86_v42 = vld [vmem:[#allocation10 + $0x68] sm:$0xff] }
  0x53   :  { %1877 = vmatprep.subr.bf16.mxu1 %v2284_v0  ;;  %v2406_v43 = vpack.c.bf16 %v182_v37, %v181_v36  ;;  %v183_v44 = vld [vmem:[#allocation11 + $0x60] sm:$0xff]  ;;  %v184_v45 = vld [vmem:[#allocation11 + $0x68] sm:$0xff]  ;;  %v1866_v46 = vpack.c.bf16 %v86_v42, %v85_v41  ;;  %v87_v47 = vld [vmem:[#allocation10 + $0x70] sm:$0xff] }
  0x54   :  { %v88_v48 = vld [vmem:[#allocation10 + $0x78] sm:$0xff]  ;;  %v2412_v49 = vpack.c.bf16 %v184_v45, %v183_v44  ;;  %v185_v50 = vld [vmem:[#allocation11 + $0x70] sm:$0xff]  ;;  %v72_v54 = vld [vmem:[#allocation5] sm:$0xff] }
  0x55   :  { %1855 = vmatpush3.bf16.msra.mxu0 %v1854_v19  ;;  %v186_v51 = vld [vmem:[#allocation11 + $0x78] sm:$0xff]  ;;  %v1869_v52 = vpack.c.bf16 %v88_v48, %v87_v47  ;;  %v2462_v62 = vld [vmem:[%s2730_s4 + $0x4] sm:$0x1]  ;;  %v2467_v2 = vld [vmem:[%s2730_s4] sm:$0x1] }
  0x56   :  { %1856 = vmatprep.subr.bf16.mxu0 %v2284_v0  ;;  %1879 = vmatpush3.bf16.msra.mxu1 %v2391_v22  ;;  %v2417_v53 = vpack.c.bf16 %v186_v51, %v185_v50  ;;  %v2470_v3 = vadd.f32 1.0, %v2462_v62  ;;  %v188_v17 = vld [vmem:[%s2730_s4 + $0x2] sm:$0x1]  ;;  %v1362_v28 = vld [vmem:[%s2730_s4 + $0x1] ss:$0 sm:$0xff] }
  0x57   :  { %1880 = vmatprep.subr.bf16.mxu1 %v2284_v0  ;;  %v161_v30 = vld [vmem:[#allocation5 + $0x8] sm:$0xff] }
  0x58   :  { %v196_v39 = vld [vmem:[#allocation2 + $0x2] sm:$0x1]  ;;  %v195_v40 = vld [vmem:[#allocation2 + $0x1] sm:$0x1]  ;;  %v194_v55 = vld [vmem:[#allocation2] sm:$0x1]  ;;  %v166_v31 = vmul.f32 %v1362_v28, %v161_v30 }
  0x59   :  { %1858 = vmatpush3.bf16.msra.mxu0 %v1857_v25  ;;  %200 = vperm.xlu0 %2077, %v196_v39   ;;  %v2515_v39 = vld [vmem:[%s2730_s4 + $0x3] sm:$0x1] }
  0x5a   :  { %1859 = vmatprep.subr.bf16.mxu0 %v2284_v0  ;;  %1882 = vmatpush3.bf16.msra.mxu1 %v2396_v29 }
  0x5b   :  { %1883 = vmatprep.subr.bf16.mxu1 %v2284_v0  ;;  %286 = vrot.lane.b32.xlu1 %v195_v40, %s2288_s3 }
  0x5d   :  { %1861 = vmatpush3.bf16.msra.mxu0 %v1860_v32 }
  0x5e   :  { %1862 = vmatprep.subr.bf16.mxu0 %v2284_v0  ;;  %1885 = vmatpush3.bf16.msra.mxu1 %v2401_v35 }
  0x5f   :  { %1886 = vmatprep.subr.bf16.mxu1 %v2284_v0 }
  0x61   :  { %1864 = vmatpush3.bf16.msra.mxu0 %v1863_v38 }
  0x62   :  { %1865 = vmatprep.subr.bf16.mxu0 %v2284_v0  ;;  %1888 = vmatpush3.bf16.msra.mxu1 %v2406_v43 }
  0x63   :  { %1889 = vmatprep.subr.bf16.mxu1 %v2284_v0 }
  0x65   :  { %1867 = vmatpush3.bf16.msra.mxu0 %v1866_v46 }
  0x66   :  { %1868 = vmatprep.subr.bf16.mxu0 %v2284_v0  ;;  %1891 = vmatpush3.bf16.msra.mxu1 %v2412_v49 }
  0x67   :  { %1892 = vmatprep.subr.bf16.mxu1 %v2284_v0 }
  0x69   :  { %1870 = vmatpush3.bf16.msra.mxu0 %v1869_v52 }
  0x6a   :  { %1895 = vmatprep.subr.bf16.mxu0 %v2284_v0  ;;  %1894 = vmatpush3.bf16.msra.mxu1 %v2417_v53 }
  0x6b   :  { %1919 = vmatprep.subr.bf16.mxu1 %v2284_v0 }
  0x6c   :  { %1565 = vmatmul.mubr.f32.vlgmr.msra.gmra.mrb[0].mxu0 %v72_v54 }
  0x6d   :  { %1897 = vmatpush3.bf16.msra.mxu0 %v2382_v11  ;;  %1634 = vmatprep.mubr.msk.f32.mxu0 %vm2285_vm0, %v2286_v1 }
  0x6e   :  { %1600 = vmatmul.mubr.f32.vlgmr.msra.gmra.mrb[0].mxu1 %v194_v55  ;;  %1898 = vmatprep.subr.bf16.mxu0 %v2284_v0 }
  0x6f   :  { %1921 = vmatpush3.bf16.msra.mxu1 %v2382_v11  ;;  %1669 = vmatprep.mubr.msk.f32.mxu1 %vm2285_vm0, %v2286_v1 }
  0x70   :  { %1922 = vmatprep.subr.bf16.mxu1 %v2284_v0 }
  0x71   :  { %1900 = vmatpush3.bf16.msra.mxu0 %v2386_v16 }
  0x72   :  { %1901 = vmatprep.subr.bf16.mxu0 %v2284_v0 }
  0x73   :  { %1924 = vmatpush3.bf16.msra.mxu1 %v2386_v16 }
  0x74   :  { %1925 = vmatprep.subr.bf16.mxu1 %v2284_v0 }
  0x75   :  { %1903 = vmatpush3.bf16.msra.mxu0 %v2391_v22 }
  0x76   :  { %1904 = vmatprep.subr.bf16.mxu0 %v2284_v0 }
  0x77   :  { %1927 = vmatpush3.bf16.msra.mxu1 %v2391_v22 }
  0x78   :  { %1928 = vmatprep.subr.bf16.mxu1 %v2284_v0 }
  0x79   :  { %1906 = vmatpush3.bf16.msra.mxu0 %v2396_v29 }
  0x7a   :  { %1907 = vmatprep.subr.bf16.mxu0 %v2284_v0 }
  0x7b   :  { %1930 = vmatpush3.bf16.msra.mxu1 %v2396_v29 }
  0x7c   :  { %1931 = vmatprep.subr.bf16.mxu1 %v2284_v0 }
  0x7d   :  { %1909 = vmatpush3.bf16.msra.mxu0 %v2401_v35 }
  0x7e   :  { %1910 = vmatprep.subr.bf16.mxu0 %v2284_v0 }
  0x7f   :  { %1933 = vmatpush3.bf16.msra.mxu1 %v2401_v35 }
  0x80   :  { %1934 = vmatprep.subr.bf16.mxu1 %v2284_v0 }
  0x81   :  { %1912 = vmatpush3.bf16.msra.mxu0 %v2406_v43 }
  0x82   :  { %1913 = vmatprep.subr.bf16.mxu0 %v2284_v0 }
  0x83   :  { %1936 = vmatpush3.bf16.msra.mxu1 %v2406_v43 }
  0x84   :  { %1937 = vmatprep.subr.bf16.mxu1 %v2284_v0 }
  0x85   :  { %1915 = vmatpush3.bf16.msra.mxu0 %v2412_v49 }
  0x86   :  { %1916 = vmatprep.subr.bf16.mxu0 %v2284_v0 }
  0x87   :  { %1939 = vmatpush3.bf16.msra.mxu1 %v2412_v49 }
  0x88   :  { %1940 = vmatprep.subr.bf16.mxu1 %v2284_v0 }
  0x89   :  { %1918 = vmatpush3.bf16.msra.mxu0 %v2417_v53 }
  0x8a   :  { %1943 = vmatprep.subr.bf16.mxu0 %v2284_v0 }
  0x8b   :  { %1942 = vmatpush3.bf16.msra.mxu1 %v2417_v53 }
  0x8c   :  { %1967 = vmatprep.subr.bf16.mxu1 %v2284_v0 }
  0xcd   :  { %v287_v18 = vpop.permute.xlu1 %286 }
  0xd8   :  { %v201_v60 = vpop.permute.xlu0 %200 }
 0x13f   :  { %v155_v56 = vpop.f32.mrb[0].mxu0 }
 0x140   :  { %159 = vst [vmem:[#allocation3] sm:$0xff] %v155_v56  ;;  %v1566_v57 = vpop.f32.mrb[1].mxu0 }
 0x141   :  { %v270_v58 = vpop.f32.mrb[0].mxu1 }
 0x142   :  { %v1601_v59 = vpop.f32.mrb[1].mxu1 }
 0x147   :  { %v197_v61 = vld [vmem:[#allocation3] sm:$0x1]  ;;  %v345_v56 = vld [vmem:[#allocation3 + $0x1] sm:$0x1] }
 0x148   :  { %v203_v63 = vmul.f32 %v201_v60, %v197_v61 }
 0x14a   :  { %v274_v4 = vadd.f32 %v270_v58, %v203_v63 }
 0x14c   :  { %v275_v5 = vadd.f32 %v274_v4, %v2467_v2 }
 0x14e   :  { %v276_v6 = vmul.f32 %v275_v5, %v2470_v3 }
 0x150   :  { %v1363_v7 = vmul.f32 -1.442695, %v276_v6 }
 0x152   :  { %2079 = vpow2.f32 %v1363_v7 }
 0x15c   :  { %v2080_v8 = vpop.eup %2079 }
 0x15d   :  { %v280_v9 = vadd.f32 1.0, %v2080_v8 }
 0x15f   :  { %2081 = vrcp.f32 %v280_v9 }
 0x169   :  { %v2082_v10 = vpop.eup %2081 }
 0x16a   :  { %v283_v12 = vmul.f32 %v2082_v10, %v2470_v3 }
 0x16c   :  { %v284_v13 = vsub.f32 %v283_v12, %v2462_v62 }
 0x16e   :  { %291 = vrot.lane.b32.xlu0 %v284_v13, %s2289_s18  ;;  %v289_v19 = vmul.f32 %v287_v18, %v284_v13 }
 0x1e0   :  { %v292_v14 = vpop.permute.xlu0 %291 }
 0x1e1   :  { %v294_v15 = vmul.f32 %v292_v14, %v284_v13 }
 0x1e3   :  { %296 = vrot.lane.b32.xlu1 %v294_v15, %s2288_s3 }
 0x1e7   :  { %307 = vrot.lane.b32.xlu1 %v188_v17, %s2290_s22 }
 0x255   :  { %v297_v20 = vpop.permute.xlu1 %296 }
 0x256   :  { %v299_v21 = vadd.f32 %v297_v20, %v289_v19 }
 0x258   :  { %2083 = vtanh.f32 %v299_v21 }
 0x259   :  { %v2483_v25 = vpop.permute.xlu1 %307 }
 0x262   :  { %v2084_v23 = vpop.eup %2083 }
 0x263   :  { %302 = vrot.lane.b32.xlu0 %v2084_v23, %s2289_s18 }
 0x2d5   :  { %v303_v24 = vpop.permute.xlu0 %302 }
 0x2d6   :  { %v305_v26 = vmul.f32 %v303_v24, %v284_v13 }
 0x2d8   :  { %329 = vrot.lane.b32.xlu0 %v305_v26, %s2288_s3  ;;  %v310_v27 = vmul.f32 %v2483_v25, %v305_v26 }
 0x2da   :  { %312 = vrot.lane.b32.xlu1 %v310_v27, %s2288_s3 }
 0x2f7   :  { %167 = vadd.xlane.f32.xlu0 %v166_v31 }
 0x34a   :  { %v330_v32 = vpop.permute.xlu0 %329 }
 0x34b   :  { %332 = vst.msk [vmem:[#allocation2] sm:$0x1] %vm315_vm1, %v330_v32 }
 0x34c   :  { %v313_v33 = vpop.permute.xlu1 %312 }
 0x34d   :  { %v316_v34 = vsel %vm315_vm1, %v313_v33, 0.0 }
 0x34e   :  { %317 = vadd.xlane.f32.xlu1 %v316_v34 }
 0x352   :  { %v342_v36 = vld [vmem:[#allocation2] sm:$0x1] }
 0x353   :  { %1635 = vmatmul.mubr.f32.vlgmr.msra.gmra.mrb[2].mxu0 %v342_v36 }
 0x354   :  { %1945 = vmatpush3.bf16.msra.mxu0 %v2382_v11  ;;  %1704 = vmatprep.mubr.msk.f32.mxu0 %vm2285_vm0, %v2286_v1 }
 0x355   :  { %1946 = vmatprep.subr.bf16.mxu0 %v2284_v0 }
 0x358   :  { %1948 = vmatpush3.bf16.msra.mxu0 %v2386_v16 }
 0x359   :  { %1949 = vmatprep.subr.bf16.mxu0 %v2284_v0 }
 0x35c   :  { %1951 = vmatpush3.bf16.msra.mxu0 %v2391_v22 }
 0x35d   :  { %1952 = vmatprep.subr.bf16.mxu0 %v2284_v0 }
 0x35f   :  { %334 = vrot.lane.b32.xlu1 %v299_v21, %s2290_s22 }
 0x360   :  { %1954 = vmatpush3.bf16.msra.mxu0 %v2396_v29 }
 0x361   :  { %1955 = vmatprep.subr.bf16.mxu0 %v2284_v0 }
 0x364   :  { %1957 = vmatpush3.bf16.msra.mxu0 %v2401_v35 }
 0x365   :  { %1958 = vmatprep.subr.bf16.mxu0 %v2284_v0 }
 0x368   :  { %1960 = vmatpush3.bf16.msra.mxu0 %v2406_v43 }
 0x369   :  { %1961 = vmatprep.subr.bf16.mxu0 %v2284_v0 }
 0x36c   :  { %1963 = vmatpush3.bf16.msra.mxu0 %v2412_v49 }
 0x36d   :  { %1964 = vmatprep.subr.bf16.mxu0 %v2284_v0 }
 0x370   :  { %1966 = vmatpush3.bf16.msra.mxu0 %v2417_v53 }
 0x371   :  { %1991 = vmatprep.subr.bf16.mxu0 %v2284_v0 }
 0x384   :  { %v168_v37 = vpop.xlane.xlu0 %167 }
 0x385   :  { %170 = vst.msk [vmem:[#allocation4] sm:$0xff] %vm169_vm2, %v168_v37 }
 0x38c   :  { %v319_v38 = vld [vmem:[#allocation4] sm:$0x1]  ;;  %v462_v27 = vld [vmem:[#allocation4 + $0x1] sm:$0x1] }
 0x3db   :  { %v318_v40 = vpop.xlane.xlu1 %317 }
 0x3dc   :  { %v320_v41 = vadd.f32 %v319_v38, %v318_v40 }
 0x3de   :  { %v321_v42 = vadd.f32 %v320_v41, %v2515_v39  ;;  %v488_v41 = vld [vmem:[#allocation3 + $0x2] sm:$0x1] }
 0x3df   :  { %v335_v44 = vpop.permute.xlu1 %334 }
 0x3e0   :  { %v1364_v45 = vmul.f32 -1.442695, %v321_v42  ;;  %337 = vst.msk [vmem:[#allocation2 + $0x1] sm:$0x1] %vm315_vm1, %v335_v44 }
 0x3e2   :  { %2085 = vpow2.f32 %v1364_v45 }
 0x3e7   :  { %v343_v46 = vld [vmem:[#allocation2 + $0x1] sm:$0x1] }
 0x3e8   :  { %434 = vrot.lane.b32.xlu1 %v343_v46, %s2288_s3 }
 0x3ec   :  { %v2086_v47 = vpop.eup %2085 }
 0x3ed   :  { %v325_v48 = vadd.f32 1.0, %v2086_v47 }
 0x3ef   :  { %2087 = vrcp.f32 %v325_v48 }
 0x3f9   :  { %v2088_v50 = vpop.eup %2087 }
 0x3fa   :  { %339 = vst.msk [vmem:[#allocation2 + $0x2] sm:$0x1] %vm338_vm3, %v2088_v50 }
 0x401   :  { %v340_v51 = vld [vmem:[#allocation2] sm:$0xff] }
 0x402   :  { %v344_v52 = vld [vmem:[#allocation2 + $0x2] sm:$0x1]  ;;  %341 = vst [vmem:[#allocation13] sm:$0xff] %v340_v51 }
 0x403   :  { %348 = vperm.xlu0 %2077, %v344_v52  }
 0x426   :  { %v418_v54 = vpop.f32.mrb[2].mxu0 }
 0x427   :  { %v1636_v55 = vpop.f32.mrb[3].mxu0 }
 0x45a   :  { %v435_v12 = vpop.permute.xlu1 %434 }
 0x482   :  { %v349_v57 = vpop.permute.xlu0 %348 }
 0x483   :  { %v351_v58 = vmul.f32 %v349_v57, %v345_v56 }
 0x485   :  { %v422_v59 = vadd.f32 %v418_v54, %v351_v58 }
 0x487   :  { %v423_v60 = vadd.f32 %v422_v59, %v2467_v2 }
 0x489   :  { %v424_v61 = vmul.f32 %v423_v60, %v2470_v3 }
 0x48b   :  { %v1365_v63 = vmul.f32 -1.442695, %v424_v61 }
 0x48d   :  { %2089 = vpow2.f32 %v1365_v63 }
 0x497   :  { %v2090_v4 = vpop.eup %2089 }
 0x498   :  { %v428_v5 = vadd.f32 1.0, %v2090_v4 }
 0x49a   :  { %2091 = vrcp.f32 %v428_v5 }
 0x4a4   :  { %v2092_v6 = vpop.eup %2091 }
 0x4a5   :  { %v431_v7 = vmul.f32 %v2092_v6, %v2470_v3 }
 0x4a7   :  { %v432_v8 = vsub.f32 %v431_v7, %v2462_v62 }
 0x4a9   :  { %439 = vrot.lane.b32.xlu0 %v432_v8, %s2289_s18  ;;  %v437_v13 = vmul.f32 %v435_v12, %v432_v8 }
 0x51b   :  { %v440_v9 = vpop.permute.xlu0 %439 }
 0x51c   :  { %v442_v10 = vmul.f32 %v440_v9, %v432_v8 }
 0x51e   :  { %444 = vrot.lane.b32.xlu0 %v442_v10, %s2288_s3 }
 0x590   :  { %v445_v14 = vpop.permute.xlu0 %444 }
 0x591   :  { %v447_v15 = vadd.f32 %v445_v14, %v437_v13 }
 0x593   :  { %2093 = vtanh.f32 %v447_v15 }
 0x59d   :  { %v2094_v17 = vpop.eup %2093 }
 0x59e   :  { %450 = vrot.lane.b32.xlu1 %v2094_v17, %s2289_s18 }
 0x610   :  { %v451_v18 = vpop.permute.xlu1 %450 }
 0x611   :  { %v453_v19 = vmul.f32 %v451_v18, %v432_v8 }
 0x613   :  { %v454_v20 = vmul.f32 %v453_v19, %v2483_v25  ;;  %472 = vrot.lane.b32.xlu0 %v453_v19, %s2288_s3 }
 0x615   :  { %456 = vrot.lane.b32.xlu1 %v454_v20, %s2288_s3 }
 0x685   :  { %v473_v21 = vpop.permute.xlu0 %472 }
 0x686   :  { %475 = vst.msk [vmem:[#allocation2] sm:$0x1] %vm315_vm1, %v473_v21 }
 0x687   :  { %v457_v23 = vpop.permute.xlu1 %456 }
 0x688   :  { %v459_v24 = vsel %vm315_vm1, %v457_v23, 0.0 }
 0x689   :  { %460 = vadd.xlane.f32.xlu0 %v459_v24 }
 0x68d   :  { %v485_v26 = vld [vmem:[#allocation2] sm:$0x1] }
 0x68e   :  { %1670 = vmatmul.mubr.f32.vlgmr.msra.gmra.mrb[2].mxu1 %v485_v26 }
 0x68f   :  { %1969 = vmatpush3.bf16.msra.mxu1 %v2382_v11  ;;  %1739 = vmatprep.mubr.msk.f32.mxu1 %vm2285_vm0, %v2286_v1 }
 0x690   :  { %1970 = vmatprep.subr.bf16.mxu1 %v2284_v0 }
 0x693   :  { %1972 = vmatpush3.bf16.msra.mxu1 %v2386_v16 }
 0x694   :  { %1973 = vmatprep.subr.bf16.mxu1 %v2284_v0 }
 0x697   :  { %1975 = vmatpush3.bf16.msra.mxu1 %v2391_v22 }
 0x698   :  { %1976 = vmatprep.subr.bf16.mxu1 %v2284_v0 }
 0x69b   :  { %1978 = vmatpush3.bf16.msra.mxu1 %v2396_v29 }
 0x69c   :  { %1979 = vmatprep.subr.bf16.mxu1 %v2284_v0 }
 0x69f   :  { %1981 = vmatpush3.bf16.msra.mxu1 %v2401_v35 }
 0x6a0   :  { %1982 = vmatprep.subr.bf16.mxu1 %v2284_v0 }
 0x6a3   :  { %1984 = vmatpush3.bf16.msra.mxu1 %v2406_v43 }
 0x6a4   :  { %1985 = vmatprep.subr.bf16.mxu1 %v2284_v0 }
 0x6a7   :  { %1987 = vmatpush3.bf16.msra.mxu1 %v2412_v49 }
 0x6a8   :  { %1988 = vmatprep.subr.bf16.mxu1 %v2284_v0 }
 0x6ab   :  { %1990 = vmatpush3.bf16.msra.mxu1 %v2417_v53 }
 0x6ac   :  { %2015 = vmatprep.subr.bf16.mxu1 %v2284_v0 }
 0x716   :  { %v461_v28 = vpop.xlane.xlu0 %460 }
 0x717   :  { %v463_v30 = vadd.f32 %v462_v27, %v461_v28 }
 0x719   :  { %v464_v31 = vadd.f32 %v463_v30, %v2515_v39 }
 0x71b   :  { %v1366_v32 = vmul.f32 -1.442695, %v464_v31 }
 0x71d   :  { %2095 = vpow2.f32 %v1366_v32  ;;  %v631_v32 = vld [vmem:[#allocation3 + $0x3] sm:$0x1] }
 0x727   :  { %v2096_v33 = vpop.eup %2095 }
 0x728   :  { %v468_v34 = vadd.f32 1.0, %v2096_v33 }
 0x72a   :  { %2097 = vrcp.f32 %v468_v34 }
 0x734   :  { %v2098_v36 = vpop.eup %2097 }
 0x735   :  { %481 = vst.msk [vmem:[#allocation2 + $0x2] sm:$0x1] %vm338_vm3, %v2098_v36 }
 0x73c   :  { %v487_v37 = vld [vmem:[#allocation2 + $0x2] sm:$0x1] }
 0x73d   :  { %491 = vperm.xlu1 %2078, %v487_v37  }
 0x741   :  { %477 = vrot.lane.b32.xlu1 %v447_v15, %s2290_s22  ;;  %v605_v15 = vld [vmem:[#allocation4 + $0x2] sm:$0x1] }
 0x761   :  { %v561_v38 = vpop.f32.mrb[2].mxu1 }
 0x762   :  { %v1671_v40 = vpop.f32.mrb[3].mxu1 }
 0x7bc   :  { %v492_v42 = vpop.permute.xlu1 %491 }
 0x7bd   :  { %v494_v44 = vmul.f32 %v492_v42, %v488_v41 }
 0x7bf   :  { %v565_v45 = vadd.f32 %v561_v38, %v494_v44 }
 0x7c0   :  { %v478_v46 = vpop.permute.xlu1 %477 }
 0x7c1   :  { %v566_v47 = vadd.f32 %v565_v45, %v2467_v2  ;;  %480 = vst.msk [vmem:[#allocation2 + $0x1] sm:$0x1] %vm315_vm1, %v478_v46 }
 0x7c3   :  { %v567_v48 = vmul.f32 %v566_v47, %v2470_v3 }
 0x7c5   :  { %v1367_v50 = vmul.f32 -1.442695, %v567_v48 }
 0x7c7   :  { %2099 = vpow2.f32 %v1367_v50 }
 0x7c8   :  { %v482_v51 = vld [vmem:[#allocation2] sm:$0xff] }
 0x7c9   :  { %484 = vst [vmem:[#allocation13 + $0x8] sm:$0xff] %v482_v51  ;;  %v486_v58 = vld [vmem:[#allocation2 + $0x1] sm:$0x1] }
 0x7d1   :  { %v2100_v52 = vpop.eup %2099 }
 0x7d2   :  { %v571_v54 = vadd.f32 1.0, %v2100_v52 }
 0x7d4   :  { %2101 = vrcp.f32 %v571_v54 }
 0x7de   :  { %v2102_v55 = vpop.eup %2101 }
 0x7df   :  { %v574_v56 = vmul.f32 %v2102_v55, %v2470_v3 }
 0x7e1   :  { %v575_v57 = vsub.f32 %v574_v56, %v2462_v62 }
 0x7e3   :  { %582 = vrot.lane.b32.xlu1 %v575_v57, %s2289_s18 }
 0x7e7   :  { %577 = vrot.lane.b32.xlu1 %v486_v58, %s2288_s3 }
 0x855   :  { %v583_v59 = vpop.permute.xlu1 %582 }
 0x856   :  { %v585_v60 = vmul.f32 %v583_v59, %v575_v57 }
 0x858   :  { %587 = vrot.lane.b32.xlu1 %v585_v60, %s2288_s3 }
 0x859   :  { %v578_v61 = vpop.permute.xlu1 %577 }
 0x85a   :  { %v580_v63 = vmul.f32 %v578_v61, %v575_v57 }
 0x8ca   :  { %v588_v4 = vpop.permute.xlu1 %587 }
 0x8cb   :  { %v590_v5 = vadd.f32 %v588_v4, %v580_v63 }
 0x8cd   :  { %2103 = vtanh.f32 %v590_v5 }
 0x8d7   :  { %v2104_v6 = vpop.eup %2103 }
 0x8d8   :  { %593 = vrot.lane.b32.xlu1 %v2104_v6, %s2289_s18 }
 0x94a   :  { %v594_v7 = vpop.permute.xlu1 %593 }
 0x94b   :  { %v596_v8 = vmul.f32 %v594_v7, %v575_v57 }
 0x94d   :  { %615 = vrot.lane.b32.xlu1 %v596_v8, %s2288_s3  ;;  %v597_v9 = vmul.f32 %v596_v8, %v2483_v25 }
 0x951   :  { %599 = vrot.lane.b32.xlu1 %v597_v9, %s2288_s3 }
 0x9bf   :  { %v616_v10 = vpop.permute.xlu1 %615 }
 0x9c0   :  { %618 = vst.msk [vmem:[#allocation2] sm:$0x1] %vm315_vm1, %v616_v10 }
 0x9c3   :  { %v600_v12 = vpop.permute.xlu1 %599 }
 0x9c4   :  { %v602_v13 = vsel %vm315_vm1, %v600_v12, 0.0 }
 0x9c5   :  { %603 = vadd.xlane.f32.xlu0 %v602_v13 }
 0x9c7   :  { %v628_v14 = vld [vmem:[#allocation2] sm:$0x1] }
 0x9c8   :  { %1705 = vmatmul.mubr.f32.vlgmr.msra.gmra.mrb[4].mxu0 %v628_v14 }
 0x9c9   :  { %1993 = vmatpush3.bf16.msra.mxu0 %v2382_v11  ;;  %1774 = vmatprep.mubr.msk.f32.mxu0 %vm2285_vm0, %v2286_v1 }
 0x9ca   :  { %1994 = vmatprep.subr.bf16.mxu0 %v2284_v0 }
 0x9cd   :  { %1996 = vmatpush3.bf16.msra.mxu0 %v2386_v16 }
 0x9ce   :  { %1997 = vmatprep.subr.bf16.mxu0 %v2284_v0 }
 0x9d1   :  { %1999 = vmatpush3.bf16.msra.mxu0 %v2391_v22 }
 0x9d2   :  { %2000 = vmatprep.subr.bf16.mxu0 %v2284_v0 }
 0x9d5   :  { %2002 = vmatpush3.bf16.msra.mxu0 %v2396_v29 }
 0x9d6   :  { %2003 = vmatprep.subr.bf16.mxu0 %v2284_v0 }
 0x9d9   :  { %2005 = vmatpush3.bf16.msra.mxu0 %v2401_v35 }
 0x9da   :  { %2006 = vmatprep.subr.bf16.mxu0 %v2284_v0 }
 0x9db   :  { %620 = vrot.lane.b32.xlu0 %v590_v5, %s2290_s22  ;;  %v748_v5 = vld [vmem:[#allocation4 + $0x3] sm:$0x1] }
 0x9dd   :  { %2008 = vmatpush3.bf16.msra.mxu0 %v2406_v43 }
 0x9de   :  { %2009 = vmatprep.subr.bf16.mxu0 %v2284_v0 }
 0x9e1   :  { %2011 = vmatpush3.bf16.msra.mxu0 %v2412_v49 }
 0x9e2   :  { %2012 = vmatprep.subr.bf16.mxu0 %v2284_v0 }
 0x9e5   :  { %2014 = vmatpush3.bf16.msra.mxu0 %v2417_v53 }
 0x9e6   :  { %2039 = vmatprep.subr.bf16.mxu0 %v2284_v0 }
 0xa52   :  { %v604_v17 = vpop.xlane.xlu0 %603 }
 0xa53   :  { %v606_v18 = vadd.f32 %v605_v15, %v604_v17 }
 0xa55   :  { %v607_v19 = vadd.f32 %v606_v18, %v2515_v39  ;;  %v774_v18 = vld [vmem:[#allocation3 + $0x4] sm:$0x1] }
 0xa56   :  { %v621_v20 = vpop.permute.xlu0 %620 }
 0xa57   :  { %v1368_v21 = vmul.f32 -1.442695, %v607_v19  ;;  %623 = vst.msk [vmem:[#allocation2 + $0x1] sm:$0x1] %vm315_vm1, %v621_v20 }
 0xa59   :  { %2105 = vpow2.f32 %v1368_v21 }
 0xa5e   :  { %v629_v47 = vld [vmem:[#allocation2 + $0x1] sm:$0x1] }
 0xa63   :  { %v2106_v23 = vpop.eup %2105 }
 0xa64   :  { %v611_v24 = vadd.f32 1.0, %v2106_v23 }
 0xa66   :  { %2107 = vrcp.f32 %v611_v24 }
 0xa70   :  { %v2108_v26 = vpop.eup %2107 }
 0xa71   :  { %624 = vst.msk [vmem:[#allocation2 + $0x2] sm:$0x1] %vm338_vm3, %v2108_v26 }
 0xa78   :  { %v630_v27 = vld [vmem:[#allocation2 + $0x2] sm:$0x1] }
 0xa79   :  { %v625_v28 = vld [vmem:[#allocation2] sm:$0xff]  ;;  %634 = vperm.xlu1 %2078, %v630_v27  }
 0xa7a   :  { %627 = vst [vmem:[#allocation13 + $0x10] sm:$0xff] %v625_v28 }
 0xa9b   :  { %v704_v30 = vpop.f32.mrb[4].mxu0 }
 0xa9c   :  { %v1706_v31 = vpop.f32.mrb[5].mxu0 }
 0xaf8   :  { %v635_v33 = vpop.permute.xlu1 %634 }
 0xaf9   :  { %v637_v34 = vmul.f32 %v635_v33, %v631_v32 }
 0xafb   :  { %v708_v36 = vadd.f32 %v704_v30, %v637_v34 }
 0xafd   :  { %v709_v37 = vadd.f32 %v708_v36, %v2467_v2 }
 0xaff   :  { %v710_v38 = vmul.f32 %v709_v37, %v2470_v3 }
 0xb01   :  { %v1369_v40 = vmul.f32 -1.442695, %v710_v38 }
 0xb03   :  { %2109 = vpow2.f32 %v1369_v40 }
 0xb0d   :  { %v2110_v41 = vpop.eup %2109 }
 0xb0e   :  { %v714_v42 = vadd.f32 1.0, %v2110_v41 }
 0xb10   :  { %2111 = vrcp.f32 %v714_v42 }
 0xb1a   :  { %v2112_v44 = vpop.eup %2111 }
 0xb1b   :  { %v717_v45 = vmul.f32 %v2112_v44, %v2470_v3 }
 0xb1d   :  { %v718_v46 = vsub.f32 %v717_v45, %v2462_v62 }
 0xb1f   :  { %725 = vrot.lane.b32.xlu1 %v718_v46, %s2289_s18 }
 0xb23   :  { %720 = vrot.lane.b32.xlu1 %v629_v47, %s2288_s3 }
 0xb91   :  { %v726_v48 = vpop.permute.xlu1 %725 }
 0xb92   :  { %v728_v50 = vmul.f32 %v726_v48, %v718_v46 }
 0xb94   :  { %730 = vrot.lane.b32.xlu1 %v728_v50, %s2288_s3 }
 0xb95   :  { %v721_v51 = vpop.permute.xlu1 %720 }
 0xb96   :  { %v723_v52 = vmul.f32 %v721_v51, %v718_v46 }
 0xc06   :  { %v731_v54 = vpop.permute.xlu1 %730 }
 0xc07   :  { %v733_v55 = vadd.f32 %v731_v54, %v723_v52 }
 0xc09   :  { %2113 = vtanh.f32 %v733_v55 }
 0xc13   :  { %v2114_v56 = vpop.eup %2113 }
 0xc14   :  { %736 = vrot.lane.b32.xlu1 %v2114_v56, %s2289_s18 }
 0xc86   :  { %v737_v57 = vpop.permute.xlu1 %736 }
 0xc87   :  { %v739_v58 = vmul.f32 %v737_v57, %v718_v46 }
 0xc89   :  { %758 = vrot.lane.b32.xlu1 %v739_v58, %s2288_s3  ;;  %v740_v59 = vmul.f32 %v739_v58, %v2483_v25 }
 0xc8d   :  { %742 = vrot.lane.b32.xlu1 %v740_v59, %s2288_s3 }
 0xcfb   :  { %v759_v60 = vpop.permute.xlu1 %758 }
 0xcfc   :  { %761 = vst.msk [vmem:[#allocation2] sm:$0x1] %vm315_vm1, %v759_v60 }
 0xcff   :  { %v743_v61 = vpop.permute.xlu1 %742 }
 0xd00   :  { %v745_v63 = vsel %vm315_vm1, %v743_v61, 0.0 }
 0xd01   :  { %746 = vadd.xlane.f32.xlu0 %v745_v63 }
 0xd03   :  { %v771_v4 = vld [vmem:[#allocation2] sm:$0x1] }
 0xd04   :  { %1740 = vmatmul.mubr.f32.vlgmr.msra.gmra.mrb[4].mxu1 %v771_v4 }
 0xd05   :  { %2017 = vmatpush3.bf16.msra.mxu1 %v2382_v11  ;;  %1809 = vmatprep.mubr.msk.f32.mxu1 %vm2285_vm0, %v2286_v1 }
 0xd06   :  { %2018 = vmatprep.subr.bf16.mxu1 %v2284_v0 }
 0xd09   :  { %2020 = vmatpush3.bf16.msra.mxu1 %v2386_v16 }
 0xd0a   :  { %2021 = vmatprep.subr.bf16.mxu1 %v2284_v0 }
 0xd0d   :  { %2023 = vmatpush3.bf16.msra.mxu1 %v2391_v22 }
 0xd0e   :  { %2024 = vmatprep.subr.bf16.mxu1 %v2284_v0 }
 0xd11   :  { %2026 = vmatpush3.bf16.msra.mxu1 %v2396_v29 }
 0xd12   :  { %2027 = vmatprep.subr.bf16.mxu1 %v2284_v0 }
 0xd15   :  { %2029 = vmatpush3.bf16.msra.mxu1 %v2401_v35 }
 0xd16   :  { %2030 = vmatprep.subr.bf16.mxu1 %v2284_v0 }
 0xd19   :  { %2032 = vmatpush3.bf16.msra.mxu1 %v2406_v43 }
 0xd1a   :  { %2033 = vmatprep.subr.bf16.mxu1 %v2284_v0 }
 0xd1d   :  { %2035 = vmatpush3.bf16.msra.mxu1 %v2412_v49 }
 0xd1e   :  { %2036 = vmatprep.subr.bf16.mxu1 %v2284_v0 }
 0xd21   :  { %2038 = vmatpush3.bf16.msra.mxu1 %v2417_v53 }
 0xd8e   :  { %v747_v6 = vpop.xlane.xlu0 %746 }
 0xd8f   :  { %v749_v7 = vadd.f32 %v748_v5, %v747_v6 }
 0xd91   :  { %v750_v8 = vadd.f32 %v749_v7, %v2515_v39 }
 0xd93   :  { %v1370_v9 = vmul.f32 -1.442695, %v750_v8 }
 0xd95   :  { %2115 = vpow2.f32 %v1370_v9 }
 0xd9f   :  { %v2116_v10 = vpop.eup %2115 }
 0xda0   :  { %v754_v12 = vadd.f32 1.0, %v2116_v10 }
 0xda2   :  { %2117 = vrcp.f32 %v754_v12 }
 0xdac   :  { %v2118_v13 = vpop.eup %2117 }
 0xdad   :  { %767 = vst.msk [vmem:[#allocation2 + $0x2] sm:$0x1] %vm338_vm3, %v2118_v13 }
 0xdb4   :  { %v773_v14 = vld [vmem:[#allocation2 + $0x2] sm:$0x1] }
 0xdb5   :  { %777 = vperm.xlu1 %2078, %v773_v14  }
 0xdb9   :  { %763 = vrot.lane.b32.xlu1 %v733_v55, %s2290_s22 }
 0xdd7   :  { %v847_v15 = vpop.f32.mrb[4].mxu1 }
 0xdd8   :  { %v1741_v17 = vpop.f32.mrb[5].mxu1 }
 0xe34   :  { %v778_v19 = vpop.permute.xlu1 %777 }
 0xe35   :  { %v780_v20 = vmul.f32 %v778_v19, %v774_v18 }
 0xe37   :  { %v851_v21 = vadd.f32 %v847_v15, %v780_v20 }
 0xe38   :  { %v764_v23 = vpop.permute.xlu1 %763 }
 0xe39   :  { %v852_v24 = vadd.f32 %v851_v21, %v2467_v2  ;;  %766 = vst.msk [vmem:[#allocation2 + $0x1] sm:$0x1] %vm315_vm1, %v764_v23 }
 0xe3b   :  { %v853_v26 = vmul.f32 %v852_v24, %v2470_v3 }
 0xe3d   :  { %v1371_v27 = vmul.f32 -1.442695, %v853_v26 }
 0xe3f   :  { %2119 = vpow2.f32 %v1371_v27 }
 0xe40   :  { %v768_v28 = vld [vmem:[#allocation2] sm:$0xff] }
 0xe41   :  { %770 = vst [vmem:[#allocation13 + $0x18] sm:$0xff] %v768_v28  ;;  %v772_v36 = vld [vmem:[#allocation2 + $0x1] sm:$0x1] }
 0xe49   :  { %v2120_v30 = vpop.eup %2119 }
 0xe4a   :  { %v857_v31 = vadd.f32 1.0, %v2120_v30 }
 0xe4c   :  { %2121 = vrcp.f32 %v857_v31  ;;  %v1034_v31 = vld [vmem:[#allocation4 + $0x5] sm:$0x1] }
 0xe56   :  { %v2122_v32 = vpop.eup %2121 }
 0xe57   :  { %v860_v33 = vmul.f32 %v2122_v32, %v2470_v3 }
 0xe59   :  { %v861_v34 = vsub.f32 %v860_v33, %v2462_v62 }
 0xe5b   :  { %868 = vrot.lane.b32.xlu1 %v861_v34, %s2289_s18 }
 0xe5f   :  { %863 = vrot.lane.b32.xlu1 %v772_v36, %s2288_s3 }
 0xecd   :  { %v869_v37 = vpop.permute.xlu1 %868 }
 0xece   :  { %v871_v38 = vmul.f32 %v869_v37, %v861_v34 }
 0xed0   :  { %873 = vrot.lane.b32.xlu1 %v871_v38, %s2288_s3 }
 0xed1   :  { %v864_v40 = vpop.permute.xlu1 %863 }
 0xed2   :  { %v866_v41 = vmul.f32 %v864_v40, %v861_v34 }
 0xf42   :  { %v874_v42 = vpop.permute.xlu1 %873 }
 0xf43   :  { %v876_v44 = vadd.f32 %v874_v42, %v866_v41 }
 0xf45   :  { %2123 = vtanh.f32 %v876_v44 }
 0xf4f   :  { %v2124_v45 = vpop.eup %2123 }
 0xf50   :  { %879 = vrot.lane.b32.xlu1 %v2124_v45, %s2289_s18  ;;  %v1060_v45 = vld [vmem:[#allocation3 + $0x6] sm:$0x1] }
 0xfc2   :  { %v880_v46 = vpop.permute.xlu1 %879 }
 0xfc3   :  { %v882_v47 = vmul.f32 %v880_v46, %v861_v34 }
 0xfc5   :  { %v883_v48 = vmul.f32 %v882_v47, %v2483_v25  ;;  %901 = vrot.lane.b32.xlu1 %v882_v47, %s2288_s3 }
 0xfc7   :  { %885 = vrot.lane.b32.xlu0 %v883_v48, %s2288_s3 }
0x1037   :  { %v902_v50 = vpop.permute.xlu1 %901 }
0x1038   :  { %904 = vst.msk [vmem:[#allocation2] sm:$0x1] %vm315_vm1, %v902_v50 }
0x1039   :  { %v886_v51 = vpop.permute.xlu0 %885 }
0x103a   :  { %v888_v52 = vsel %vm315_vm1, %v886_v51, 0.0 }
0x103b   :  { %889 = vadd.xlane.f32.xlu1 %v888_v52 }
0x103f   :  { %v914_v54 = vld [vmem:[#allocation2] sm:$0x1] }
0x1040   :  { %1775 = vmatmul.mubr.f32.vlgmr.msra.gmra.mrb[6].mxu0 %v914_v54 }
0x1041   :  { %2041 = vmatpush3.bf16.msra.mxu0 %v2382_v11  ;;  %1844 = vmatprep.mubr.msk.f32.mxu0 %vm2285_vm0, %v2286_v1  ;;  %v891_v1 = vld [vmem:[#allocation4 + $0x4] sm:$0x1] }
0x1042   :  { %2042 = vmatprep.subr.bf16.mxu0 %v2284_v0 }
0x1045   :  { %2044 = vmatpush3.bf16.msra.mxu0 %v2386_v16 }
0x1046   :  { %2045 = vmatprep.subr.bf16.mxu0 %v2284_v0 }
0x1049   :  { %2047 = vmatpush3.bf16.msra.mxu0 %v2391_v22 }
0x104a   :  { %2048 = vmatprep.subr.bf16.mxu0 %v2284_v0 }
0x104d   :  { %2050 = vmatpush3.bf16.msra.mxu0 %v2396_v29 }
0x104e   :  { %2051 = vmatprep.subr.bf16.mxu0 %v2284_v0 }
0x1051   :  { %2053 = vmatpush3.bf16.msra.mxu0 %v2401_v35 }
0x1052   :  { %2054 = vmatprep.subr.bf16.mxu0 %v2284_v0 }
0x1055   :  { %2056 = vmatpush3.bf16.msra.mxu0 %v2406_v43 }
0x1056   :  { %2057 = vmatprep.subr.bf16.mxu0 %v2284_v0 }
0x1059   :  { %2059 = vmatpush3.bf16.msra.mxu0 %v2412_v49 }
0x105a   :  { %2060 = vmatprep.subr.bf16.mxu0 %v2284_v0 }
0x105d   :  { %2062 = vmatpush3.bf16.msra.mxu0 %v2417_v53  ;;  %v917_v53 = vld [vmem:[#allocation3 + $0x5] sm:$0x1] }
0x10c8   :  { %v890_v11 = vpop.xlane.xlu1 %889 }
0x10c9   :  { %v892_v16 = vadd.f32 %v891_v1, %v890_v11 }
0x10cb   :  { %v893_v22 = vadd.f32 %v892_v16, %v2515_v39 }
0x10cd   :  { %v1372_v29 = vmul.f32 -1.442695, %v893_v22 }
0x10cf   :  { %2125 = vpow2.f32 %v1372_v29 }
0x10d9   :  { %v2126_v35 = vpop.eup %2125 }
0x10da   :  { %v897_v55 = vadd.f32 1.0, %v2126_v35 }
0x10dc   :  { %2127 = vrcp.f32 %v897_v55 }
0x10e6   :  { %v2128_v56 = vpop.eup %2127 }
0x10e7   :  { %910 = vst.msk [vmem:[#allocation2 + $0x2] sm:$0x1] %vm338_vm3, %v2128_v56 }
0x10ee   :  { %v916_v43 = vld [vmem:[#allocation2 + $0x2] sm:$0x1] }
0x10ef   :  { %920 = vperm.xlu0 %2077, %v916_v43  }
0x10f3   :  { %906 = vrot.lane.b32.xlu0 %v876_v44, %s2290_s22 }
0x1113   :  { %v990_v0 = vpop.f32.mrb[6].mxu0 }
0x1114   :  { %v1776_v49 = vpop.f32.mrb[7].mxu0 }
0x116e   :  { %v921_v57 = vpop.permute.xlu0 %920 }
0x116f   :  { %v923_v58 = vmul.f32 %v921_v57, %v917_v53 }
0x1171   :  { %v994_v59 = vadd.f32 %v990_v0, %v923_v58 }
0x1172   :  { %v907_v60 = vpop.permute.xlu0 %906 }
0x1173   :  { %v995_v61 = vadd.f32 %v994_v59, %v2467_v2  ;;  %909 = vst.msk [vmem:[#allocation2 + $0x1] sm:$0x1] %vm315_vm1, %v907_v60 }
0x1175   :  { %v996_v63 = vmul.f32 %v995_v61, %v2470_v3 }
0x1177   :  { %v1373_v4 = vmul.f32 -1.442695, %v996_v63 }
0x1179   :  { %2129 = vpow2.f32 %v1373_v4 }
0x117a   :  { %v911_v5 = vld [vmem:[#allocation2] sm:$0xff] }
0x117b   :  { %913 = vst [vmem:[#allocation13 + $0x20] sm:$0xff] %v911_v5  ;;  %v915_v12 = vld [vmem:[#allocation2 + $0x1] sm:$0x1] }
0x1183   :  { %v2130_v6 = vpop.eup %2129 }
0x1184   :  { %v1000_v7 = vadd.f32 1.0, %v2130_v6  ;;  %v1177_v6 = vld [vmem:[#allocation4 + $0x6] sm:$0x1] }
0x1186   :  { %2131 = vrcp.f32 %v1000_v7 }
0x1190   :  { %v2132_v8 = vpop.eup %2131 }
0x1191   :  { %v1003_v9 = vmul.f32 %v2132_v8, %v2470_v3 }
0x1193   :  { %v1004_v10 = vsub.f32 %v1003_v9, %v2462_v62 }
0x1195   :  { %1011 = vrot.lane.b32.xlu0 %v1004_v10, %s2289_s18 }
0x1199   :  { %1006 = vrot.lane.b32.xlu0 %v915_v12, %s2288_s3 }
0x1207   :  { %v1012_v13 = vpop.permute.xlu0 %1011 }
0x1208   :  { %v1014_v14 = vmul.f32 %v1012_v13, %v1004_v10 }
0x120a   :  { %1016 = vrot.lane.b32.xlu1 %v1014_v14, %s2288_s3 }
0x120b   :  { %v1007_v15 = vpop.permute.xlu0 %1006 }
0x120c   :  { %v1009_v17 = vmul.f32 %v1007_v15, %v1004_v10 }
0x127c   :  { %v1017_v18 = vpop.permute.xlu1 %1016 }
0x127d   :  { %v1019_v19 = vadd.f32 %v1017_v18, %v1009_v17 }
0x127f   :  { %2133 = vtanh.f32 %v1019_v19 }
0x1289   :  { %v2134_v20 = vpop.eup %2133 }
0x128a   :  { %1022 = vrot.lane.b32.xlu0 %v2134_v20, %s2289_s18 }
0x12fc   :  { %v1023_v21 = vpop.permute.xlu0 %1022 }
0x12fd   :  { %v1025_v23 = vmul.f32 %v1023_v21, %v1004_v10 }
0x12ff   :  { %1044 = vrot.lane.b32.xlu0 %v1025_v23, %s2288_s3  ;;  %v1026_v24 = vmul.f32 %v1025_v23, %v2483_v25 }
0x1303   :  { %1028 = vrot.lane.b32.xlu0 %v1026_v24, %s2288_s3 }
0x1371   :  { %v1045_v26 = vpop.permute.xlu0 %1044 }
0x1372   :  { %1047 = vst.msk [vmem:[#allocation2] sm:$0x1] %vm315_vm1, %v1045_v26 }
0x1375   :  { %v1029_v27 = vpop.permute.xlu0 %1028 }
0x1376   :  { %v1031_v28 = vsel %vm315_vm1, %v1029_v27, 0.0 }
0x1377   :  { %1032 = vadd.xlane.f32.xlu0 %v1031_v28 }
0x1379   :  { %v1057_v30 = vld [vmem:[#allocation2] sm:$0x1] }
0x137a   :  { %1810 = vmatmul.mubr.f32.vlgmr.msra.gmra.mrb[6].mxu1 %v1057_v30 }
0x1404   :  { %v1033_v32 = vpop.xlane.xlu0 %1032 }
0x1405   :  { %v1035_v33 = vadd.f32 %v1034_v31, %v1033_v32 }
0x1407   :  { %v1036_v34 = vadd.f32 %v1035_v33, %v2515_v39 }
0x1409   :  { %v1374_v36 = vmul.f32 -1.442695, %v1036_v34 }
0x140b   :  { %2135 = vpow2.f32 %v1374_v36  ;;  %v2159_v36 = vld [vmem:[%s2730_s4 + $0x4] sm:$0x1]  ;;  %s2291_s4 = smov [#allocation13]  }
0x140c   :  { %s1348_s29 = sshll.u32 %s2291_s4, 4  ;;  %s1349_s29 = int_to_ptr.vmem [resolvable:$true] %s1348_s29 }
0x140d   :  { %s2248_s30 = scalar_lea.vmem %s1349_s29, 1024  ;;  %p2253_p5 = scmp.lt.s32.totalorder %s1349_s29, %s1349_s29 }
0x140e   :  { %p2249_p4 = scmp.ne.s32.totalorder %s1349_s29, %s2248_s30  ;;  %p2254_p6 = scmp.lt.s32.totalorder %s2248_s30, %s2248_s30 }
0x1410   :  { %p2255_p7 = por %p2254_p6, %p2253_p5 }
0x1412   :  { %p2256_p8 = pnand %p2255_p7, %p2249_p4 }
0x1415   :  { %v2136_v37 = vpop.eup %2135 }
0x1416   :  { %v1040_v38 = vadd.f32 1.0, %v2136_v37 }
0x1418   :  { %2137 = vrcp.f32 %v1040_v38 }
0x1422   :  { %v2138_v40 = vpop.eup %2137 }
0x1423   :  { %1053 = vst.msk [vmem:[#allocation2 + $0x2] sm:$0x1] %vm338_vm3, %v2138_v40 }
0x142a   :  { %v1059_v41 = vld [vmem:[#allocation2 + $0x2] sm:$0x1] }
0x142b   :  { %1063 = vperm.xlu1 %2078, %v1059_v41  }
0x142f   :  { %1049 = vrot.lane.b32.xlu1 %v1019_v19, %s2290_s22  ;;  %v1203_v19 = vld [vmem:[#allocation3 + $0x7] sm:$0x1] }
0x144d   :  { %v1133_v42 = vpop.f32.mrb[6].mxu1 }
0x144e   :  { %v1811_v44 = vpop.f32.mrb[7].mxu1 }
0x14aa   :  { %v1064_v46 = vpop.permute.xlu1 %1063 }
0x14ab   :  { %v1066_v47 = vmul.f32 %v1064_v46, %v1060_v45 }
0x14ad   :  { %v1137_v48 = vadd.f32 %v1133_v42, %v1066_v47 }
0x14ae   :  { %v1050_v50 = vpop.permute.xlu1 %1049 }
0x14af   :  { %v1138_v51 = vadd.f32 %v1137_v48, %v2467_v2  ;;  %1052 = vst.msk [vmem:[#allocation2 + $0x1] sm:$0x1] %vm315_vm1, %v1050_v50 }
0x14b1   :  { %v1139_v52 = vmul.f32 %v1138_v51, %v2470_v3 }
0x14b3   :  { %v1375_v54 = vmul.f32 -1.442695, %v1139_v52 }
0x14b5   :  { %2139 = vpow2.f32 %v1375_v54 }
0x14b6   :  { %v1054_v1 = vld [vmem:[#allocation2] sm:$0xff] }
0x14b7   :  { %1056 = vst [vmem:[#allocation13 + $0x28] sm:$0xff] %v1054_v1  ;;  %v1058_v55 = vld [vmem:[#allocation2 + $0x1] sm:$0x1]  ;;  %v1320_v1 = vld [vmem:[#allocation4 + $0x7] sm:$0x1] }
0x14bf   :  { %v2140_v11 = vpop.eup %2139 }
0x14c0   :  { %v1143_v16 = vadd.f32 1.0, %v2140_v11 }
0x14c2   :  { %2141 = vrcp.f32 %v1143_v16 }
0x14cc   :  { %v2142_v22 = vpop.eup %2141 }
0x14cd   :  { %v1146_v29 = vmul.f32 %v2142_v22, %v2470_v3 }
0x14cf   :  { %v1147_v35 = vsub.f32 %v1146_v29, %v2462_v62 }
0x14d1   :  { %1154 = vrot.lane.b32.xlu1 %v1147_v35, %s2289_s18 }
0x14d5   :  { %1149 = vrot.lane.b32.xlu1 %v1058_v55, %s2288_s3 }
0x1543   :  { %v1155_v56 = vpop.permute.xlu1 %1154 }
0x1544   :  { %v1157_v43 = vmul.f32 %v1155_v56, %v1147_v35 }
0x1546   :  { %1159 = vrot.lane.b32.xlu1 %v1157_v43, %s2288_s3 }
0x1547   :  { %v1150_v0 = vpop.permute.xlu1 %1149 }
0x1548   :  { %v1152_v49 = vmul.f32 %v1150_v0, %v1147_v35 }
0x15b8   :  { %v1160_v53 = vpop.permute.xlu1 %1159 }
0x15b9   :  { %v1162_v57 = vadd.f32 %v1160_v53, %v1152_v49 }
0x15bb   :  { %2143 = vtanh.f32 %v1162_v57 }
0x15c5   :  { %v2144_v58 = vpop.eup %2143 }
0x15c6   :  { %1165 = vrot.lane.b32.xlu1 %v2144_v58, %s2289_s18 }
0x1638   :  { %v1166_v59 = vpop.permute.xlu1 %1165 }
0x1639   :  { %v1168_v60 = vmul.f32 %v1166_v59, %v1147_v35 }
0x163b   :  { %v1169_v62 = vmul.f32 %v1168_v60, %v2483_v25  ;;  %1187 = vrot.lane.b32.xlu1 %v1168_v60, %s2288_s3 }
0x163d   :  { %1171 = vrot.lane.b32.xlu0 %v1169_v62, %s2288_s3 }
0x16ad   :  { %v1188_v61 = vpop.permute.xlu1 %1187 }
0x16ae   :  { %1190 = vst.msk [vmem:[#allocation2] sm:$0x1] %vm315_vm1, %v1188_v61 }
0x16af   :  { %v1172_v63 = vpop.permute.xlu0 %1171 }
0x16b0   :  { %v1174_v4 = vsel %vm315_vm1, %v1172_v63, 0.0 }
0x16b1   :  { %1175 = vadd.xlane.f32.xlu1 %v1174_v4 }
0x16b5   :  { %v1200_v5 = vld [vmem:[#allocation2] sm:$0x1] }
0x16b6   :  { %1845 = vmatmul.mubr.f32.vlgmr.msra.gmra.mrb[8].mxu0 %v1200_v5 }
0x173e   :  { %v1176_v7 = vpop.xlane.xlu1 %1175 }
0x173f   :  { %v1178_v8 = vadd.f32 %v1177_v6, %v1176_v7 }
0x1741   :  { %v1179_v9 = vadd.f32 %v1178_v8, %v2515_v39 }
0x1743   :  { %v1376_v10 = vmul.f32 -1.442695, %v1179_v9 }
0x1745   :  { %2145 = vpow2.f32 %v1376_v10 }
0x174f   :  { %v2146_v12 = vpop.eup %2145 }
0x1750   :  { %v1183_v13 = vadd.f32 1.0, %v2146_v12 }
0x1752   :  { %2147 = vrcp.f32 %v1183_v13 }
0x175c   :  { %v2148_v14 = vpop.eup %2147 }
0x175d   :  { %1196 = vst.msk [vmem:[#allocation2 + $0x2] sm:$0x1] %vm338_vm3, %v2148_v14 }
0x1764   :  { %v1202_v15 = vld [vmem:[#allocation2 + $0x2] sm:$0x1] }
0x1765   :  { %1206 = vperm.xlu0 %2077, %v1202_v15  }
0x1769   :  { %1192 = vrot.lane.b32.xlu0 %v1162_v57, %s2290_s22 }
0x1789   :  { %v1276_v17 = vpop.f32.mrb[8].mxu0 }
0x178a   :  { %v1846_v18 = vpop.f32.mrb[9].mxu0 }
0x17e4   :  { %v1207_v20 = vpop.permute.xlu0 %1206 }
0x17e5   :  { %v1209_v21 = vmul.f32 %v1207_v20, %v1203_v19 }
0x17e7   :  { %v1280_v23 = vadd.f32 %v1276_v17, %v1209_v21 }
0x17e8   :  { %v1193_v24 = vpop.permute.xlu0 %1192 }
0x17e9   :  { %v1281_v26 = vadd.f32 %v1280_v23, %v2467_v2  ;;  %1195 = vst.msk [vmem:[#allocation2 + $0x1] sm:$0x1] %vm315_vm1, %v1193_v24 }
0x17eb   :  { %v1282_v27 = vmul.f32 %v1281_v26, %v2470_v3 }
0x17ed   :  { %v1377_v28 = vmul.f32 -1.442695, %v1282_v27 }
0x17ef   :  { %2149 = vpow2.f32 %v1377_v28 }
0x17f0   :  { %v1197_v30 = vld [vmem:[#allocation2] sm:$0xff] }
0x17f1   :  { %1199 = vst [vmem:[#allocation13 + $0x30] sm:$0xff] %v1197_v30  ;;  %v1201_v2 = vld [vmem:[#allocation2 + $0x1] sm:$0x1] }
0x17f9   :  { %v2150_v31 = vpop.eup %2149 }
0x17fa   :  { %v1286_v32 = vadd.f32 1.0, %v2150_v31 }
0x17fc   :  { %2151 = vrcp.f32 %v1286_v32 }
0x1806   :  { %v2152_v33 = vpop.eup %2151 }
0x1807   :  { %v1289_v34 = vmul.f32 %v2152_v33, %v2470_v3 }
0x1809   :  { %v1290_v37 = vsub.f32 %v1289_v34, %v2159_v36 }
0x180b   :  { %1297 = vrot.lane.b32.xlu0 %v1290_v37, %s2289_s18 }
0x180f   :  { %1292 = vrot.lane.b32.xlu0 %v1201_v2, %s2288_s3 }
0x187d   :  { %v1298_v38 = vpop.permute.xlu0 %1297 }
0x187e   :  { %v1300_v40 = vmul.f32 %v1298_v38, %v1290_v37 }
0x1880   :  { %1302 = vrot.lane.b32.xlu1 %v1300_v40, %s2288_s3 }
0x1881   :  { %v1293_v41 = vpop.permute.xlu0 %1292 }
0x1882   :  { %v1295_v42 = vmul.f32 %v1293_v41, %v1290_v37 }
0x18f2   :  { %v1303_v44 = vpop.permute.xlu1 %1302 }
0x18f3   :  { %v1305_v45 = vadd.f32 %v1303_v44, %v1295_v42 }
0x18f5   :  { %2153 = vtanh.f32 %v1305_v45 }
0x18ff   :  { %v2154_v3 = vpop.eup %2153 }
0x1900   :  { %1308 = vrot.lane.b32.xlu0 %v2154_v3, %s2289_s18 }
0x1972   :  { %v1309_v46 = vpop.permute.xlu0 %1308 }
0x1973   :  { %v1311_v47 = vmul.f32 %v1309_v46, %v1290_v37 }
0x1975   :  { %v1312_v48 = vmul.f32 %v1311_v47, %v2483_v25  ;;  %1330 = vrot.lane.b32.xlu1 %v1311_v47, %s2288_s3 }
0x1977   :  { %1314 = vrot.lane.b32.xlu0 %v1312_v48, %s2288_s3 }
0x1979   :  { %1335 = vrot.lane.b32.xlu1 %v1305_v45, %s2290_s22 }
0x19e7   :  { %v1331_v50 = vpop.permute.xlu1 %1330 }
0x19e8   :  { %1333 = vst.msk [vmem:[#allocation2] sm:$0x1] %vm315_vm1, %v1331_v50 }
0x19e9   :  { %v1315_v51 = vpop.permute.xlu0 %1314 }
0x19ea   :  { %v1317_v52 = vsel %vm315_vm1, %v1315_v51, 0.0 }
0x19eb   :  { %v1336_v54 = vpop.permute.xlu1 %1335  ;;  %1318 = vadd.xlane.f32.xlu0 %v1317_v52 }
0x19ec   :  { %1338 = vst.msk [vmem:[#allocation2 + $0x1] sm:$0x1] %vm315_vm1, %v1336_v54 }
0x1a78   :  { %v1319_v11 = vpop.xlane.xlu0 %1318 }
0x1a79   :  { %v1321_v16 = vadd.f32 %v1320_v1, %v1319_v11 }
0x1a7b   :  { %v1322_v25 = vadd.f32 %v1321_v16, %v2515_v39 }
0x1a7d   :  { %v1378_v22 = vmul.f32 -1.442695, %v1322_v25 }
0x1a7f   :  { %2155 = vpow2.f32 %v1378_v22 }
0x1a89   :  { %v2156_v29 = vpop.eup %2155 }
0x1a8a   :  { %v1326_v35 = vadd.f32 1.0, %v2156_v29 }
0x1a8c   :  { %2157 = vrcp.f32 %v1326_v35 }
0x1a96   :  { %v2158_v55 = vpop.eup %2157 }
0x1a97   :  { %1339 = vst.msk [vmem:[#allocation2 + $0x2] sm:$0x1] %vm338_vm3, %v2158_v55 }
0x1a9e   :  { %v1340_v56 = vld [vmem:[#allocation2] sm:$0xff] }
0x1a9f   :  { %1342 = vst [vmem:[#allocation13 + $0x38] sm:$0xff] %v1340_v56 }
0x1aa0   :  { %2259 = shalt.err (!%p2256_p8)
}
0x1aa1   :  { %s2260_s8 = scalar_lea.hbm %s2731_s5, 1024 }
0x1aa2   :  { %p2261_p9 = scmp.ne.s32.totalorder %s2731_s5, %s2260_s8  ;;  %p2264_p10 = scmp.lt.u32.totalorder %s2260_s8, %s2731_s5 }
0x1aa4   :  { %p2266_p11 = pnand %p2264_p10, %p2261_p9 }
0x1aa6   :  { %2269 = shalt.err (!%p2266_p11)
}
0x1aa7   :  { %1354 = dma.vmem_to_hbm [thread:$0]  %s1349_s29, 1024, %s2731_s5, [#allocation7], %s2281_s0, %s2281_s0, %s2282_s21  }
0x1aa8   :  { %2276 = dma.done.wait [#allocation7], 1024  }
0x1aa9   :  { %2277 = vsyncadd [#allocation7], 4294966272 }
0x1aaa   :  { %1358 = vsyncpa [#allocation6], 1 }
0x1aab   :  { %1359 = vsyncpa [#allocation9], 1 }
0x1aac   :  { %1360 = vsyncpa [#allocation12], 1 }
0x1aad   :  { %1361 = vsyncpa [#allocation7], 1 }

</bundles_post_ra>
